<compile_context>
chip_gen: v7x
topology: tpu7x:2x2x1
jax: 0.10.0
libtpu: 0.0.40
codegen_flags: <defaults>
</compile_context>

<pallas_src>
import functools
import math

import numpy as np
import jax
import jax.numpy as jnp
from jax.experimental import pallas as pl
from jax.experimental.pallas import tpu as pltpu

# ----------------------------- configuration --------------------------------
CFG = dict(
    layers=2, blocks=2,
    dilation_channels=8, residual_channels=8, skip_channels=16,
    end_channels=[16, 8], output_channels=1,
    output_length=8, kernel_size=2, dilation_factor=2, bias=True,
    conditioning_channels=[4, 8, 8], conditioning_period=4,
)


def build_dilations(cfg):
    receptive_field = 1
    init_dilation = 1
    dils = []
    for _b in range(cfg["blocks"]):
        additional_scope = cfg["kernel_size"] - 1
        new_dilation = 1
        for _i in range(cfg["layers"]):
            dils.append((new_dilation, init_dilation))
            receptive_field += additional_scope
            additional_scope *= cfg["dilation_factor"]
            init_dilation = new_dilation
            new_dilation *= cfg["dilation_factor"]
    return dils, receptive_field


DILATIONS, RECEPTIVE_FIELD = build_dilations(CFG)


# --------------------- static plan of the dilate() bookkeeping ---------------
def _plan_forward(cfg, cond_len):
    """Trace-time bookkeeping of the reference dilate()/view() data movement.

    Activations live as 2-D slabs (rows = l-major, n-minor flattening of
    (N, L); cols = channels).  dilate() only re-interprets the (n, l)
    factorization of the row index -- the slab itself is unchanged except for
    the occasional 1-frame zero pad -- so every layer reduces to matmuls plus
    constant row shifts.

    NOTE: the reference dilate() pads by exactly 1 frame when padding is
    needed (its length variable is overwritten *before* the pad amount is
    computed).  That quirk is deliberately reproduced here (pad_l = 1) and
    asserted against the .view() that would otherwise fail in torch.  Do not
    "fix" one side without the other.
    """
    K = cfg["kernel_size"]
    P = cfg["conditioning_period"]
    out_len = cfg["output_length"]
    in_len = RECEPTIVE_FIELD + out_len - 1

    n, l = 1, in_len                       # batch folding starts at N == 1
    max_rows = n * l
    tiled_len = cond_len * P               # conditioning after repeat(1,1,1,P)

    layers = []
    skip_rows, skip_n = None, None
    for (d, d0) in DILATIONS:
        factor = d / d0
        if factor == 1:
            pad_rows, n_res, l_res = 0, n, l
        else:
            new_l = int(np.ceil(l / factor) * factor)
            pad_l = 0 if new_l == l else 1           # reference pad-by-1 quirk
            l_res = math.ceil(new_l * d0 / d)
            n_res = math.ceil(n * d / d0)
            assert n_res * l_res == n * (l + pad_l), "dilate() view mismatch"
            pad_rows = pad_l * n
        r_res = n_res * l_res
        l_out = l_res - (K - 1)
        r_out = l_out * n_res
        max_rows = max(max_rows, r_res)

        # conditioning branch: repeat(P) -> dilate(dil_c) -> [:, :, :l_out]
        dil_c = n_res                      # == residual.size(0) // cond.size(0)
        if dil_c == 1:
            cpad_rows, l_c = 0, tiled_len
        else:
            new_tl = int(np.ceil(tiled_len / dil_c) * dil_c)
            cpad_l = 0 if new_tl == tiled_len else 1
            l_c = math.ceil(new_tl * 1 / dil_c)
            assert dil_c * l_c == tiled_len + cpad_l, "cond dilate() mismatch"
            cpad_rows = cpad_l
        assert l_c >= l_out, "conditioning shorter than layer output"

        # skip path: dilate(x, 1, init_dilation=d) never pads -> same slab
        if d == 1:
            n_s = n_res
        else:
            n_s = math.ceil(n_res / d)
            assert n_s * (l_out * d) == r_out
        if skip_rows is None:
            skip_shift = 0
        else:
            assert skip_n == n_s
            skip_shift = skip_rows - r_out
            assert skip_shift >= 0
        skip_rows, skip_n = r_out, n_s

        layers.append(dict(pad_rows=pad_rows, n_res=n_res,
                           cond_pad_rows=cpad_rows, skip_shift=skip_shift))
        n, l = n_res, l_out
    assert skip_n == 1, "final skip tensor expected to have batch 1"

    rows = ((max_rows + 7) // 8) * 8       # pad slab rows to a sublane multiple
    return dict(rows=rows, layers=layers, r_final=skip_rows,
                in_len=in_len, out_len=out_len)


# ------------------------------ the fused kernel ------------------------------
def _make_wavenet_kernel(plan, cfg, cond_has_bias, n_end):
    rows = plan["rows"]
    Cd = cfg["dilation_channels"]
    Csk = cfg["skip_channels"]

    def shift_rows(x, s):
        """result[i, :] = x[i + s, :]; rows outside [0, rows) read as zero.

        s is a compile-time constant -> static sublane rotate (XLU slot) plus
        an iota mask, i.e. O(rows * C) instead of the previous O(rows^2 * C)
        selector matmul on the MXU critical path.  The zero-fill is required
        to preserve the dilate() zero-pad semantics (wrapped rows must not
        survive).
        """
        if s == 0:
            return x
        rolled = pltpu.roll(x, (-s) % rows, axis=0)
        r = jax.lax.broadcasted_iota(jnp.int32, x.shape, 0)
        keep = (r < rows - s) if s > 0 else (r >= -s)
        return jnp.where(keep, rolled, 0.0)

    def kernel(*refs):
        it = iter(refs)
        audio_ref, cond_ref = next(it), next(it)
        start_w, start_b = next(it), next(it)
        cond_net = []
        for has_b in cond_has_bias:
            w = next(it)
            b = next(it) if has_b else None
            cond_net.append((w, b))
        w_fg, b_fg = next(it), next(it)
        w_sr, b_sr = next(it), next(it)
        end_net = [(next(it), next(it)) for _ in range(n_end)]
        out_ref = next(it)

        dot = functools.partial(jnp.dot, preferred_element_type=jnp.float32,
                                precision=jax.lax.Precision.HIGHEST)

        # ---- start conv (1x1) --------------------------------------------
        x = dot(audio_ref[...], start_w[...]) + start_b[...]          # (rows, Cr)

        # ---- conditioning network: 1x1 conv + ELU per layer ---------------
        # The conditioning input was cyclically pre-tiled to `rows` rows in
        # the wrapper (the net is pointwise, so tiling the input is bitwise
        # identical to tiling the output), so the reference's
        # repeat(P)/dilate()/[:l_out] reduces to the per-layer cond_pad shift
        # below -- no in-kernel gather and no gather matmul.
        cond = cond_ref[...]                                          # (rows, Cc0)
        for (w, b) in cond_net:
            y = dot(cond, w[...])
            if b is not None:
                y = y + b[...]
            # ELU; exp only ever sees the non-positive branch (inf-safe).
            # |exp(t)-1 - expm1(t)| <= ~1.2e-7 absolute here, far below the
            # 1e-4 cross-check (expm1 lowering on Mosaic is not relied on).
            cond = jnp.where(y > 0.0, y, jnp.exp(jnp.minimum(y, 0.0)) - 1.0)

        # ---- wavenet layers (unrolled; activations never leave VMEM/vregs) --
        skip = None
        for i, lm in enumerate(plan["layers"]):
            residual = shift_rows(x, -lm["pad_rows"])     # dilate(): only the pad moves data
            res_k1 = shift_rows(residual, lm["n_res"])    # residual[:, :, K-1:] == conv tap 1
            cnd = shift_rows(cond, -lm["cond_pad_rows"])
            # ONE fused matmul per gated unit: [residual | tap1 | cond]
            # against the pre-stacked filter|gate weights (contraction depth
            # 2*Cr+Cc=24 instead of three depth-8 matmuls on the chain).
            fg_in = jnp.concatenate([residual, res_k1, cnd], axis=1)  # (rows, 2Cr+Cc)
            fg = dot(fg_in, w_fg[i]) + b_fg[i]                        # (rows, 2*Cd)
            xg = jnp.tanh(fg[:, :Cd]) * jax.nn.sigmoid(fg[:, Cd:])    # static lane split
            # ONE fused matmul for the skip + residual 1x1 convs.
            sr = dot(xg, w_sr[i]) + b_sr[i]                           # (rows, Csk+Cr)
            s_new = sr[:, :Csk]
            # skip path: un-dilation is a pure row re-interpretation (same slab)
            skip = s_new if skip is None else s_new + shift_rows(skip, lm["skip_shift"])
            # residual path (re-uses res_k1 == residual[:, :, K-1:])
            x = sr[:, Csk:] + res_k1

        # ---- end layers: conv(relu(x)) ------------------------------------
        y = skip
        for (w, b) in end_net:
            y = dot(jnp.maximum(y, 0.0), w[...]) + b[...]
        # c_out=1 -> a single masked store at this toy size; for production
        # row tiling emit a lane-dense slab instead (review note).
        out_ref[...] = y                                              # (rows, C_out)

    return kernel


# ------------------------------- forward wrapper ------------------------------
def forward(params, audio, conditioning):
    cfg = CFG
    n_a, c_a, l_a = audio.shape
    n_c, c_c, l_c = conditioning.shape
    assert n_a == 1 and n_c == 1, "dilate()-folded forward is defined for batch 1"

    plan = _plan_forward(cfg, l_c)
    rows, in_len, out_len = plan["rows"], plan["in_len"], plan["out_len"]
    assert l_a >= in_len
    n_layers = cfg["layers"] * cfg["blocks"]
    c_out = cfg["output_channels"]
    Cr, Cd, Csk = cfg["residual_channels"], cfg["dilation_channels"], cfg["skip_channels"]
    Cc = cfg["conditioning_channels"]

    # channel-last slabs (rows = length-major flattening), zero padded to `rows`
    a = audio[:, :, -in_len:]
    a_slab = jnp.transpose(a, (2, 0, 1)).reshape(in_len * n_a, c_a)
    a_slab = jnp.pad(a_slab, ((0, rows - in_len * n_a), (0, 0)))

    # Conditioning, cyclically pre-tiled to `rows` frames (period l_c).  The
    # reference's repeat(1,1,1,P).view(...) is torch-tile semantics, so frame
    # r of the tiled conditioning is frame (r mod l_c); tiling the INPUT of
    # the pointwise conditioning net here (plain XLA, trivial) is bitwise
    # identical to tiling its output and removes the in-kernel row gather.
    c_slab = jnp.transpose(conditioning, (2, 0, 1)).reshape(l_c * n_c, c_c)
    nrep = -(-rows // (l_c * n_c))
    c_slab = jnp.tile(c_slab, (nrep, 1))[:rows, :]

    # pack weights:
    #  * filter|gate (both conv taps) and their conditioning 1x1 convs stacked
    #    along the contraction axis -> one (2*Cr+Cc, 2*Cd) matmul per layer;
    #    biases pre-summed (filter_b+fcond_b | gate_b+gcond_b).
    #  * skip|residual 1x1 convs concatenated -> one (Cd, Csk+Cr) matmul.
    #  Per-layer tensors stacked on a leading axis -> static kernel indexing,
    #  one VMEM-resident stack each instead of many tiny operands.
    w_fg = jnp.stack([
        jnp.concatenate([
            jnp.concatenate([params["filter_w"][i][0], params["gate_w"][i][0]], axis=1),
            jnp.concatenate([params["filter_w"][i][1], params["gate_w"][i][1]], axis=1),
            jnp.concatenate([params["fcond_w"][i], params["gcond_w"][i]], axis=1),
        ], axis=0)
        for i in range(n_layers)])                                   # (L, 2Cr+Cc, 2Cd)
    b_fg = jnp.stack([
        jnp.concatenate([params["filter_b"][i] + params["fcond_b"][i],
                         params["gate_b"][i] + params["gcond_b"][i]])[None, :]
        for i in range(n_layers)])                                   # (L, 1, 2Cd)
    w_sr = jnp.stack([jnp.concatenate([params["skip_w"][i], params["res_w"][i]], axis=1)
                      for i in range(n_layers)])                     # (L, Cd, Csk+Cr)
    b_sr = jnp.stack([jnp.concatenate([params["skip_b"][i], params["res_b"][i]])[None, :]
                      for i in range(n_layers)])                     # (L, 1, Csk+Cr)

    inputs = [a_slab, c_slab, params["start_w"], params["start_b"].reshape(1, -1)]
    cond_has_bias = []
    for w, b in zip(params["cond_w"], params["cond_b"]):
        inputs.append(w)
        cond_has_bias.append(b is not None)
        if b is not None:
            inputs.append(b.reshape(1, -1))
    inputs += [w_fg, b_fg, w_sr, b_sr]
    for w, b in params["end"]:
        inputs += [w, b.reshape(1, -1)]

    kernel = _make_wavenet_kernel(plan, cfg, cond_has_bias, len(params["end"]))

    # honest advisory cost estimate: 2 fused matmuls per layer + start/cond/end
    flops = 2 * rows * c_a * Cr
    flops += sum(2 * rows * Cc[i] * Cc[i + 1] for i in range(len(Cc) - 1))
    flops += n_layers * (2 * rows * (2 * Cr + Cc[-1]) * (2 * Cd)
                         + 2 * rows * Cd * (Csk + Cr))
    flops += sum(2 * rows * w.shape[0] * w.shape[1] for w, _ in params["end"])
    trans = rows * (sum(Cc[1:]) + n_layers * 4 * Cd)
    bytes_accessed = 4 * (sum(int(np.prod(t.shape)) for t in inputs) + rows * c_out)
    cost = pl.CostEstimate(flops=int(flops), transcendentals=int(trans),
                           bytes_accessed=int(bytes_accessed))

    # Single invocation, no grid: whole arrays live (single-buffered) in VMEM
    # for the duration of the call.  At production sizes: tile `rows` with a
    # "parallel" grid axis sized for the chip's VMEM (halve for v7x's 64 MiB),
    # cast matmul operands to bf16 on v6e/v7x (f32 elementwise on v5e).
    vmem = pltpu.MemorySpace.VMEM
    out_raw = pl.pallas_call(
        kernel,
        out_shape=jax.ShapeDtypeStruct((rows, c_out), jnp.float32),
        in_specs=[pl.BlockSpec(memory_space=vmem) for _ in inputs],
        out_specs=pl.BlockSpec(memory_space=vmem),
        cost_estimate=cost,
    )(*inputs)

    y = out_raw[plan["r_final"] - out_len: plan["r_final"], :]      # last output_length frames
    return jnp.transpose(y, (1, 0))[None]                           # (1, C_out, output_length)


# --------------------------------- parameters ---------------------------------
def init_params(key):
    cfg = CFG
    n_layers = cfg["layers"] * cfg["blocks"]
    Cr, Cd, Csk = cfg["residual_channels"], cfg["dilation_channels"], cfg["skip_channels"]
    K = cfg["kernel_size"]
    cc = cfg["conditioning_channels"]

    kit = iter(jax.random.split(key, 1024))

    def nrm(shape, scale):
        return scale * jax.random.normal(next(kit), shape, dtype=jnp.float32)

    p = {}
    p["start_w"] = nrm((1, Cr), 0.5)
    p["start_b"] = nrm((Cr,), 0.1)
    p["filter_w"] = [nrm((K, Cr, Cd), 0.25) for _ in range(n_layers)]
    p["filter_b"] = [nrm((Cd,), 0.05) for _ in range(n_layers)]
    p["gate_w"] = [nrm((K, Cr, Cd), 0.25) for _ in range(n_layers)]
    p["gate_b"] = [nrm((Cd,), 0.05) for _ in range(n_layers)]
    p["fcond_w"] = [nrm((cc[-1], Cd), 0.25) for _ in range(n_layers)]
    p["fcond_b"] = [nrm((Cd,), 0.05) for _ in range(n_layers)]
    p["gcond_w"] = [nrm((cc[-1], Cd), 0.25) for _ in range(n_layers)]
    p["gcond_b"] = [nrm((Cd,), 0.05) for _ in range(n_layers)]
    p["res_w"] = [nrm((Cd, Cr), 0.25) for _ in range(n_layers)]
    p["res_b"] = [nrm((Cr,), 0.05) for _ in range(n_layers)]
    p["skip_w"] = [nrm((Cd, Csk), 0.25) for _ in range(n_layers)]
    p["skip_b"] = [nrm((Csk,), 0.05) for _ in range(n_layers)]
    # conditioning network (first layer bias=False)
    p["cond_w"] = [nrm((cc[i], cc[i + 1]), 0.3) for i in range(len(cc) - 1)]
    p["cond_b"] = [None if i == 0 else nrm((cc[i + 1],), 0.05)
                   for i in range(len(cc) - 1)]
    # end layers
    ends = []
    in_c = Csk
    for ec in cfg["end_channels"] + [cfg["output_channels"]]:
        ends.append((nrm((in_c, ec), 0.25), nrm((ec,), 0.05)))
        in_c = ec
    p["end"] = ends
    return p


# -------------------- pure-JAX reference (numerical cross-check) --------------
def dilate(x, dilation, init_dilation=1, pad_start=True):
    """Exact JAX port of the reference dilate() (incl. its pad-by-1 behavior)."""
    n, c, l = x.shape
    if n == 1 and l == 1:
        return x
    dilation_factor = dilation / init_dilation
    if dilation_factor == 1:
        return x
    new_l = int(np.ceil(l / dilation_factor) * dilation_factor)
    if new_l != l:
        l = new_l
        if pad_start:
            x = jnp.pad(x, ((0, 0), (0, 0), (new_l - l + 1, 0)))
        else:
            x = jnp.pad(x, ((0, 0), (0, 0), (0, new_l - l + 1)))
    l = math.ceil(l * init_dilation / dilation)
    n = math.ceil(n * dilation / init_dilation)
    x = jnp.transpose(x, (1, 2, 0))
    x = jnp.reshape(x, (c, l, n))
    x = jnp.transpose(x, (2, 0, 1))
    return x


def _ref_conv1x1(x, w, b):
    y = jnp.einsum("ncl,cd->ndl", x, w, precision="highest")
    if b is not None:
        y = y + b[None, :, None]
    return y


def _reference_forward(params, audio, conditioning):
    cfg = CFG
    K, P, out_len = cfg["kernel_size"], cfg["conditioning_period"], cfg["output_length"]

    cond = conditioning
    for w, b in zip(params["cond_w"], params["cond_b"]):
        y = _ref_conv1x1(cond, w, b)
        cond = jnp.where(y > 0.0, y, jnp.expm1(jnp.minimum(y, 0.0)))

    x = _ref_conv1x1(audio[:, :, -(RECEPTIVE_FIELD + out_len - 1):],
                     params["start_w"], params["start_b"])
    skip = None
    for i, (dilation, init_dilation) in enumerate(DILATIONS):
        residual = dilate(x, dilation, init_dilation)
        l_out = residual.shape[2] - (K - 1)
        dil_c = residual.shape[0] // cond.shape[0]
        fcond = jnp.tile(_ref_conv1x1(cond, params["fcond_w"][i], params["fcond_b"][i]), (1, 1, P))
        gcond = jnp.tile(_ref_conv1x1(cond, params["gcond_w"][i], params["gcond_b"][i]), (1, 1, P))
        fcond = dilate(fcond, dil_c, 1)[:, :, :l_out]
        gcond = dilate(gcond, dil_c, 1)[:, :, :l_out]
        f = (jnp.einsum("ncl,cd->ndl", residual[:, :, :l_out], params["filter_w"][i][0], precision="highest")
             + jnp.einsum("ncl,cd->ndl", residual[:, :, 1:], params["filter_w"][i][1], precision="highest")
             + params["filter_b"][i][None, :, None] + fcond)
        g = (jnp.einsum("ncl,cd->ndl", residual[:, :, :l_out], params["gate_w"][i][0], precision="highest")
             + jnp.einsum("ncl,cd->ndl", residual[:, :, 1:], params["gate_w"][i][1], precision="highest")
             + params["gate_b"][i][None, :, None] + gcond)
        xg = jnp.tanh(f) * jax.nn.sigmoid(g)
        s = dilate(xg, 1, init_dilation=dilation) if xg.shape[2] != 0 else xg
        s = _ref_conv1x1(s, params["skip_w"][i], params["skip_b"][i])
        skip = s if skip is None else s + skip[:, :, -s.shape[2]:]
        x = _ref_conv1x1(xg, params["res_w"][i], params["res_b"][i]) + residual[:, :, K - 1:]
    x = skip
    for w, b in params["end"]:
        x = _ref_conv1x1(jnp.maximum(x, 0.0), w, b)
    return x[:, :, -out_len:]


# ----------------------------------- main ------------------------------------
if __name__ == "__main__":
    key = jax.random.PRNGKey(0)
    kp, ka, kc = jax.random.split(key, 3)
    params = init_params(kp)

    # audio: (N=1, C=1, L=16); forward uses the last receptive_field+out_len-1=14
    audio = jax.random.normal(ka, (1, 1, 16), dtype=jnp.float32)
    # conditioning: (N=1, conditioning_channels[0]=4, L_c=4); period=4 -> 16 frames
    cond = jax.random.normal(kc, (1, CFG["conditioning_channels"][0], 4),
                             dtype=jnp.float32)

    out = jax.jit(forward)(params, audio, cond)
    out = jax.block_until_ready(out)

    assert out.shape == (1, CFG["output_channels"], CFG["output_length"]), out.shape
    assert bool(jnp.all(jnp.isfinite(out)))

    # numerical cross-check vs. a plain-JAX port of the original module
    # (tightened: kernel matmuls use precision=HIGHEST, both sides are f32)
    ref = _reference_forward(params, audio, cond)
    np.testing.assert_allclose(np.asarray(out), np.asarray(ref), rtol=1e-4, atol=1e-4)

    print("KERNEL_OK")
</pallas_src>

<mosaic_0001>
module attributes {stable_mosaic.version = 11 : i64} {
  func.func @kernel(%arg0: memref<16x1xf32, #tpu.memory_space<vmem>>, %arg1: memref<16x4xf32, #tpu.memory_space<vmem>>, %arg2: memref<1x8xf32, #tpu.memory_space<vmem>>, %arg3: memref<1x8xf32, #tpu.memory_space<vmem>>, %arg4: memref<4x8xf32, #tpu.memory_space<vmem>>, %arg5: memref<8x8xf32, #tpu.memory_space<vmem>>, %arg6: memref<1x8xf32, #tpu.memory_space<vmem>>, %arg7: memref<4x24x16xf32, #tpu.memory_space<vmem>>, %arg8: memref<4x1x16xf32, #tpu.memory_space<vmem>>, %arg9: memref<4x8x24xf32, #tpu.memory_space<vmem>>, %arg10: memref<4x1x24xf32, #tpu.memory_space<vmem>>, %arg11: memref<16x16xf32, #tpu.memory_space<vmem>>, %arg12: memref<1x16xf32, #tpu.memory_space<vmem>>, %arg13: memref<16x8xf32, #tpu.memory_space<vmem>>, %arg14: memref<1x8xf32, #tpu.memory_space<vmem>>, %arg15: memref<8x1xf32, #tpu.memory_space<vmem>>, %arg16: memref<1x1xf32, #tpu.memory_space<vmem>>, %arg17: memref<16x1xf32, #tpu.memory_space<vmem>>) attributes {dimension_semantics = [], scalar_prefetch = 0 : i64, scratch_operands = 0 : i64, tpu.core_type = #tpu.core_type<tc>} {
    %c0 = arith.constant 0 : index
    %c0_0 = arith.constant 0 : index
    %0 = vector.load %arg0[%c0, %c0_0] : memref<16x1xf32, #tpu.memory_space<vmem>>, vector<16x1xf32>
    %c0_1 = arith.constant 0 : index
    %c0_2 = arith.constant 0 : index
    %1 = vector.load %arg2[%c0_1, %c0_2] : memref<1x8xf32, #tpu.memory_space<vmem>>, vector<1x8xf32>
    %cst = arith.constant dense<0.000000e+00> : vector<16x8xf32>
    %2 = tpu.matmul %0, %1, %cst {dimension_numbers = #tpu.dot_dimension_numbers<[1], [0], [0], [1], [0, 0, 1, 1], [], []>, precision = #tpu.contract_precision<fp32>} : vector<16x1xf32>, vector<1x8xf32>, vector<16x8xf32> -> vector<16x8xf32>
    %c0_3 = arith.constant 0 : index
    %c0_4 = arith.constant 0 : index
    %3 = vector.load %arg3[%c0_3, %c0_4] : memref<1x8xf32, #tpu.memory_space<vmem>>, vector<1x8xf32>
    %4 = vector.broadcast %3 : vector<1x8xf32> to vector<16x8xf32>
    %5 = arith.addf %2, %4 : vector<16x8xf32>
    %c0_5 = arith.constant 0 : index
    %c0_6 = arith.constant 0 : index
    %6 = vector.load %arg1[%c0_5, %c0_6] : memref<16x4xf32, #tpu.memory_space<vmem>>, vector<16x4xf32>
    %c0_7 = arith.constant 0 : index
    %c0_8 = arith.constant 0 : index
    %7 = vector.load %arg4[%c0_7, %c0_8] : memref<4x8xf32, #tpu.memory_space<vmem>>, vector<4x8xf32>
    %cst_9 = arith.constant dense<0.000000e+00> : vector<16x8xf32>
    %8 = tpu.matmul %6, %7, %cst_9 {dimension_numbers = #tpu.dot_dimension_numbers<[1], [0], [0], [1], [0, 0, 1, 1], [], []>, precision = #tpu.contract_precision<fp32>} : vector<16x4xf32>, vector<4x8xf32>, vector<16x8xf32> -> vector<16x8xf32>
    %cst_10 = arith.constant 0.000000e+00 : f32
    %9 = vector.broadcast %cst_10 : f32 to vector<16x8xf32>
    %10 = arith.cmpf ogt, %8, %9 : vector<16x8xf32>
    %cst_11 = arith.constant 0.000000e+00 : f32
    %11 = vector.broadcast %cst_11 : f32 to vector<16x8xf32>
    %12 = arith.minimumf %8, %11 : vector<16x8xf32>
    %13 = math.exp %12 : vector<16x8xf32>
    %cst_12 = arith.constant 1.000000e+00 : f32
    %14 = vector.broadcast %cst_12 : f32 to vector<16x8xf32>
    %15 = arith.subf %13, %14 : vector<16x8xf32>
    %16 = arith.select %10, %8, %15 : vector<16x8xi1>, vector<16x8xf32>
    %c0_13 = arith.constant 0 : index
    %c0_14 = arith.constant 0 : index
    %17 = vector.load %arg5[%c0_13, %c0_14] : memref<8x8xf32, #tpu.memory_space<vmem>>, vector<8x8xf32>
    %cst_15 = arith.constant dense<0.000000e+00> : vector<16x8xf32>
    %18 = tpu.matmul %16, %17, %cst_15 {dimension_numbers = #tpu.dot_dimension_numbers<[1], [0], [0], [1], [0, 0, 1, 1], [], []>, precision = #tpu.contract_precision<fp32>} : vector<16x8xf32>, vector<8x8xf32>, vector<16x8xf32> -> vector<16x8xf32>
    %c0_16 = arith.constant 0 : index
    %c0_17 = arith.constant 0 : index
    %19 = vector.load %arg6[%c0_16, %c0_17] : memref<1x8xf32, #tpu.memory_space<vmem>>, vector<1x8xf32>
    %20 = vector.broadcast %19 : vector<1x8xf32> to vector<16x8xf32>
    %21 = arith.addf %18, %20 : vector<16x8xf32>
    %cst_18 = arith.constant 0.000000e+00 : f32
    %22 = vector.broadcast %cst_18 : f32 to vector<16x8xf32>
    %23 = arith.cmpf ogt, %21, %22 : vector<16x8xf32>
    %cst_19 = arith.constant 0.000000e+00 : f32
    %24 = vector.broadcast %cst_19 : f32 to vector<16x8xf32>
    %25 = arith.minimumf %21, %24 : vector<16x8xf32>
    %26 = math.exp %25 : vector<16x8xf32>
    %cst_20 = arith.constant 1.000000e+00 : f32
    %27 = vector.broadcast %cst_20 : f32 to vector<16x8xf32>
    %28 = arith.subf %26, %27 : vector<16x8xf32>
    %29 = arith.select %23, %21, %28 : vector<16x8xi1>, vector<16x8xf32>
    %c15_i32 = arith.constant 15 : i32
    %30 = tpu.dynamic_rotate %5 by %c15_i32 dim 0 : vector<16x8xf32>, i32 -> vector<16x8xf32>
    %31 = tpu.iota {dimensions = array<i32: 0>} : vector<16x8xi32>
    %c15_i32_21 = arith.constant 15 : i32
    %32 = vector.broadcast %c15_i32_21 : i32 to vector<16x8xi32>
    %33 = arith.cmpi slt, %31, %32 : vector<16x8xi32>
    %cst_22 = arith.constant 0.000000e+00 : f32
    %34 = vector.broadcast %cst_22 : f32 to vector<16x8xf32>
    %35 = arith.select %33, %30, %34 : vector<16x8xi1>, vector<16x8xf32>
    %36 = tpu.concatenate %5, %35, %29 in 1 : vector<16x8xf32>, vector<16x8xf32>, vector<16x8xf32> -> vector<16x24xf32>
    %c0_23 = arith.constant 0 : index
    %c0_24 = arith.constant 0 : index
    %c0_25 = arith.constant 0 : index
    %37 = vector.load %arg7[%c0_23, %c0_24, %c0_25] : memref<4x24x16xf32, #tpu.memory_space<vmem>>, vector<1x24x16xf32>
    %38 = vector.shape_cast %37 : vector<1x24x16xf32> to vector<24x16xf32>
    %cst_26 = arith.constant dense<0.000000e+00> : vector<16x16xf32>
    %39 = tpu.matmul %36, %38, %cst_26 {dimension_numbers = #tpu.dot_dimension_numbers<[1], [0], [0], [1], [0, 0, 1, 1], [], []>, precision = #tpu.contract_precision<fp32>} : vector<16x24xf32>, vector<24x16xf32>, vector<16x16xf32> -> vector<16x16xf32>
    %c0_27 = arith.constant 0 : index
    %c0_28 = arith.constant 0 : index
    %c0_29 = arith.constant 0 : index
    %40 = vector.load %arg8[%c0_27, %c0_28, %c0_29] : memref<4x1x16xf32, #tpu.memory_space<vmem>>, vector<1x1x16xf32>
    %41 = vector.shape_cast %40 : vector<1x1x16xf32> to vector<1x16xf32>
    %42 = vector.broadcast %41 : vector<1x16xf32> to vector<16x16xf32>
    %43 = arith.addf %39, %42 : vector<16x16xf32>
    %44 = vector.extract_strided_slice %43 {offsets = [0, 0], sizes = [16, 8], strides = [1, 1]} : vector<16x16xf32> to vector<16x8xf32>
    %45 = math.tanh %44 : vector<16x8xf32>
    %46 = vector.extract_strided_slice %43 {offsets = [0, 8], sizes = [16, 8], strides = [1, 1]} : vector<16x16xf32> to vector<16x8xf32>
    %47 = arith.negf %46 : vector<16x8xf32>
    %48 = math.exp %47 : vector<16x8xf32>
    %cst_30 = arith.constant 1.000000e+00 : f32
    %49 = vector.broadcast %cst_30 : f32 to vector<16x8xf32>
    %50 = arith.addf %49, %48 : vector<16x8xf32>
    %51 = arith.divf %49, %50 : vector<16x8xf32>
    %52 = arith.mulf %45, %51 : vector<16x8xf32>
    %c0_31 = arith.constant 0 : index
    %c0_32 = arith.constant 0 : index
    %c0_33 = arith.constant 0 : index
    %53 = vector.load %arg9[%c0_31, %c0_32, %c0_33] : memref<4x8x24xf32, #tpu.memory_space<vmem>>, vector<1x8x24xf32>
    %54 = vector.shape_cast %53 : vector<1x8x24xf32> to vector<8x24xf32>
    %cst_34 = arith.constant dense<0.000000e+00> : vector<16x24xf32>
    %55 = tpu.matmul %52, %54, %cst_34 {dimension_numbers = #tpu.dot_dimension_numbers<[1], [0], [0], [1], [0, 0, 1, 1], [], []>, precision = #tpu.contract_precision<fp32>} : vector<16x8xf32>, vector<8x24xf32>, vector<16x24xf32> -> vector<16x24xf32>
    %c0_35 = arith.constant 0 : index
    %c0_36 = arith.constant 0 : index
    %c0_37 = arith.constant 0 : index
    %56 = vector.load %arg10[%c0_35, %c0_36, %c0_37] : memref<4x1x24xf32, #tpu.memory_space<vmem>>, vector<1x1x24xf32>
    %57 = vector.shape_cast %56 : vector<1x1x24xf32> to vector<1x24xf32>
    %58 = vector.broadcast %57 : vector<1x24xf32> to vector<16x24xf32>
    %59 = arith.addf %55, %58 : vector<16x24xf32>
    %60 = vector.extract_strided_slice %59 {offsets = [0, 0], sizes = [16, 16], strides = [1, 1]} : vector<16x24xf32> to vector<16x16xf32>
    %61 = vector.extract_strided_slice %59 {offsets = [0, 16], sizes = [16, 8], strides = [1, 1]} : vector<16x24xf32> to vector<16x8xf32>
    %62 = arith.addf %61, %35 : vector<16x8xf32>
    %c1_i32 = arith.constant 1 : i32
    %63 = tpu.dynamic_rotate %62 by %c1_i32 dim 0 : vector<16x8xf32>, i32 -> vector<16x8xf32>
    %64 = tpu.iota {dimensions = array<i32: 0>} : vector<16x8xi32>
    %c1_i32_38 = arith.constant 1 : i32
    %65 = vector.broadcast %c1_i32_38 : i32 to vector<16x8xi32>
    %66 = arith.cmpi sge, %64, %65 : vector<16x8xi32>
    %cst_39 = arith.constant 0.000000e+00 : f32
    %67 = vector.broadcast %cst_39 : f32 to vector<16x8xf32>
    %68 = arith.select %66, %63, %67 : vector<16x8xi1>, vector<16x8xf32>
    %c14_i32 = arith.constant 14 : i32
    %69 = tpu.dynamic_rotate %68 by %c14_i32 dim 0 : vector<16x8xf32>, i32 -> vector<16x8xf32>
    %70 = tpu.iota {dimensions = array<i32: 0>} : vector<16x8xi32>
    %c14_i32_40 = arith.constant 14 : i32
    %71 = vector.broadcast %c14_i32_40 : i32 to vector<16x8xi32>
    %72 = arith.cmpi slt, %70, %71 : vector<16x8xi32>
    %cst_41 = arith.constant 0.000000e+00 : f32
    %73 = vector.broadcast %cst_41 : f32 to vector<16x8xf32>
    %74 = arith.select %72, %69, %73 : vector<16x8xi1>, vector<16x8xf32>
    %75 = tpu.concatenate %68, %74, %29 in 1 : vector<16x8xf32>, vector<16x8xf32>, vector<16x8xf32> -> vector<16x24xf32>
    %c1 = arith.constant 1 : index
    %c0_42 = arith.constant 0 : index
    %c0_43 = arith.constant 0 : index
    %76 = vector.load %arg7[%c1, %c0_42, %c0_43] : memref<4x24x16xf32, #tpu.memory_space<vmem>>, vector<1x24x16xf32>
    %77 = vector.shape_cast %76 : vector<1x24x16xf32> to vector<24x16xf32>
    %cst_44 = arith.constant dense<0.000000e+00> : vector<16x16xf32>
    %78 = tpu.matmul %75, %77, %cst_44 {dimension_numbers = #tpu.dot_dimension_numbers<[1], [0], [0], [1], [0, 0, 1, 1], [], []>, precision = #tpu.contract_precision<fp32>} : vector<16x24xf32>, vector<24x16xf32>, vector<16x16xf32> -> vector<16x16xf32>
    %c1_45 = arith.constant 1 : index
    %c0_46 = arith.constant 0 : index
    %c0_47 = arith.constant 0 : index
    %79 = vector.load %arg8[%c1_45, %c0_46, %c0_47] : memref<4x1x16xf32, #tpu.memory_space<vmem>>, vector<1x1x16xf32>
    %80 = vector.shape_cast %79 : vector<1x1x16xf32> to vector<1x16xf32>
    %81 = vector.broadcast %80 : vector<1x16xf32> to vector<16x16xf32>
    %82 = arith.addf %78, %81 : vector<16x16xf32>
    %83 = vector.extract_strided_slice %82 {offsets = [0, 0], sizes = [16, 8], strides = [1, 1]} : vector<16x16xf32> to vector<16x8xf32>
    %84 = math.tanh %83 : vector<16x8xf32>
    %85 = vector.extract_strided_slice %82 {offsets = [0, 8], sizes = [16, 8], strides = [1, 1]} : vector<16x16xf32> to vector<16x8xf32>
    %86 = arith.negf %85 : vector<16x8xf32>
    %87 = math.exp %86 : vector<16x8xf32>
    %cst_48 = arith.constant 1.000000e+00 : f32
    %88 = vector.broadcast %cst_48 : f32 to vector<16x8xf32>
    %89 = arith.addf %88, %87 : vector<16x8xf32>
    %90 = arith.divf %88, %89 : vector<16x8xf32>
    %91 = arith.mulf %84, %90 : vector<16x8xf32>
    %c1_49 = arith.constant 1 : index
    %c0_50 = arith.constant 0 : index
    %c0_51 = arith.constant 0 : index
    %92 = vector.load %arg9[%c1_49, %c0_50, %c0_51] : memref<4x8x24xf32, #tpu.memory_space<vmem>>, vector<1x8x24xf32>
    %93 = vector.shape_cast %92 : vector<1x8x24xf32> to vector<8x24xf32>
    %cst_52 = arith.constant dense<0.000000e+00> : vector<16x24xf32>
    %94 = tpu.matmul %91, %93, %cst_52 {dimension_numbers = #tpu.dot_dimension_numbers<[1], [0], [0], [1], [0, 0, 1, 1], [], []>, precision = #tpu.contract_precision<fp32>} : vector<16x8xf32>, vector<8x24xf32>, vector<16x24xf32> -> vector<16x24xf32>
    %c1_53 = arith.constant 1 : index
    %c0_54 = arith.constant 0 : index
    %c0_55 = arith.constant 0 : index
    %95 = vector.load %arg10[%c1_53, %c0_54, %c0_55] : memref<4x1x24xf32, #tpu.memory_space<vmem>>, vector<1x1x24xf32>
    %96 = vector.shape_cast %95 : vector<1x1x24xf32> to vector<1x24xf32>
    %97 = vector.broadcast %96 : vector<1x24xf32> to vector<16x24xf32>
    %98 = arith.addf %94, %97 : vector<16x24xf32>
    %99 = vector.extract_strided_slice %98 {offsets = [0, 0], sizes = [16, 16], strides = [1, 1]} : vector<16x24xf32> to vector<16x16xf32>
    %c15_i32_56 = arith.constant 15 : i32
    %100 = tpu.dynamic_rotate %60 by %c15_i32_56 dim 0 : vector<16x16xf32>, i32 -> vector<16x16xf32>
    %101 = tpu.iota {dimensions = array<i32: 0>} : vector<16x16xi32>
    %c15_i32_57 = arith.constant 15 : i32
    %102 = vector.broadcast %c15_i32_57 : i32 to vector<16x16xi32>
    %103 = arith.cmpi slt, %101, %102 : vector<16x16xi32>
    %cst_58 = arith.constant 0.000000e+00 : f32
    %104 = vector.broadcast %cst_58 : f32 to vector<16x16xf32>
    %105 = arith.select %103, %100, %104 : vector<16x16xi1>, vector<16x16xf32>
    %106 = arith.addf %99, %105 : vector<16x16xf32>
    %107 = vector.extract_strided_slice %98 {offsets = [0, 16], sizes = [16, 8], strides = [1, 1]} : vector<16x24xf32> to vector<16x8xf32>
    %108 = arith.addf %107, %74 : vector<16x8xf32>
    %c15_i32_59 = arith.constant 15 : i32
    %109 = tpu.dynamic_rotate %108 by %c15_i32_59 dim 0 : vector<16x8xf32>, i32 -> vector<16x8xf32>
    %110 = tpu.iota {dimensions = array<i32: 0>} : vector<16x8xi32>
    %c15_i32_60 = arith.constant 15 : i32
    %111 = vector.broadcast %c15_i32_60 : i32 to vector<16x8xi32>
    %112 = arith.cmpi slt, %110, %111 : vector<16x8xi32>
    %cst_61 = arith.constant 0.000000e+00 : f32
    %113 = vector.broadcast %cst_61 : f32 to vector<16x8xf32>
    %114 = arith.select %112, %109, %113 : vector<16x8xi1>, vector<16x8xf32>
    %115 = tpu.concatenate %108, %114, %29 in 1 : vector<16x8xf32>, vector<16x8xf32>, vector<16x8xf32> -> vector<16x24xf32>
    %c2 = arith.constant 2 : index
    %c0_62 = arith.constant 0 : index
    %c0_63 = arith.constant 0 : index
    %116 = vector.load %arg7[%c2, %c0_62, %c0_63] : memref<4x24x16xf32, #tpu.memory_space<vmem>>, vector<1x24x16xf32>
    %117 = vector.shape_cast %116 : vector<1x24x16xf32> to vector<24x16xf32>
    %cst_64 = arith.constant dense<0.000000e+00> : vector<16x16xf32>
    %118 = tpu.matmul %115, %117, %cst_64 {dimension_numbers = #tpu.dot_dimension_numbers<[1], [0], [0], [1], [0, 0, 1, 1], [], []>, precision = #tpu.contract_precision<fp32>} : vector<16x24xf32>, vector<24x16xf32>, vector<16x16xf32> -> vector<16x16xf32>
    %c2_65 = arith.constant 2 : index
    %c0_66 = arith.constant 0 : index
    %c0_67 = arith.constant 0 : index
    %119 = vector.load %arg8[%c2_65, %c0_66, %c0_67] : memref<4x1x16xf32, #tpu.memory_space<vmem>>, vector<1x1x16xf32>
    %120 = vector.shape_cast %119 : vector<1x1x16xf32> to vector<1x16xf32>
    %121 = vector.broadcast %120 : vector<1x16xf32> to vector<16x16xf32>
    %122 = arith.addf %118, %121 : vector<16x16xf32>
    %123 = vector.extract_strided_slice %122 {offsets = [0, 0], sizes = [16, 8], strides = [1, 1]} : vector<16x16xf32> to vector<16x8xf32>
    %124 = math.tanh %123 : vector<16x8xf32>
    %125 = vector.extract_strided_slice %122 {offsets = [0, 8], sizes = [16, 8], strides = [1, 1]} : vector<16x16xf32> to vector<16x8xf32>
    %126 = arith.negf %125 : vector<16x8xf32>
    %127 = math.exp %126 : vector<16x8xf32>
    %cst_68 = arith.constant 1.000000e+00 : f32
    %128 = vector.broadcast %cst_68 : f32 to vector<16x8xf32>
    %129 = arith.addf %128, %127 : vector<16x8xf32>
    %130 = arith.divf %128, %129 : vector<16x8xf32>
    %131 = arith.mulf %124, %130 : vector<16x8xf32>
    %c2_69 = arith.constant 2 : index
    %c0_70 = arith.constant 0 : index
    %c0_71 = arith.constant 0 : index
    %132 = vector.load %arg9[%c2_69, %c0_70, %c0_71] : memref<4x8x24xf32, #tpu.memory_space<vmem>>, vector<1x8x24xf32>
    %133 = vector.shape_cast %132 : vector<1x8x24xf32> to vector<8x24xf32>
    %cst_72 = arith.constant dense<0.000000e+00> : vector<16x24xf32>
    %134 = tpu.matmul %131, %133, %cst_72 {dimension_numbers = #tpu.dot_dimension_numbers<[1], [0], [0], [1], [0, 0, 1, 1], [], []>, precision = #tpu.contract_precision<fp32>} : vector<16x8xf32>, vector<8x24xf32>, vector<16x24xf32> -> vector<16x24xf32>
    %c2_73 = arith.constant 2 : index
    %c0_74 = arith.constant 0 : index
    %c0_75 = arith.constant 0 : index
    %135 = vector.load %arg10[%c2_73, %c0_74, %c0_75] : memref<4x1x24xf32, #tpu.memory_space<vmem>>, vector<1x1x24xf32>
    %136 = vector.shape_cast %135 : vector<1x1x24xf32> to vector<1x24xf32>
    %137 = vector.broadcast %136 : vector<1x24xf32> to vector<16x24xf32>
    %138 = arith.addf %134, %137 : vector<16x24xf32>
    %139 = vector.extract_strided_slice %138 {offsets = [0, 0], sizes = [16, 16], strides = [1, 1]} : vector<16x24xf32> to vector<16x16xf32>
    %c15_i32_76 = arith.constant 15 : i32
    %140 = tpu.dynamic_rotate %106 by %c15_i32_76 dim 0 : vector<16x16xf32>, i32 -> vector<16x16xf32>
    %141 = tpu.iota {dimensions = array<i32: 0>} : vector<16x16xi32>
    %c15_i32_77 = arith.constant 15 : i32
    %142 = vector.broadcast %c15_i32_77 : i32 to vector<16x16xi32>
    %143 = arith.cmpi slt, %141, %142 : vector<16x16xi32>
    %cst_78 = arith.constant 0.000000e+00 : f32
    %144 = vector.broadcast %cst_78 : f32 to vector<16x16xf32>
    %145 = arith.select %143, %140, %144 : vector<16x16xi1>, vector<16x16xf32>
    %146 = arith.addf %139, %145 : vector<16x16xf32>
    %147 = vector.extract_strided_slice %138 {offsets = [0, 16], sizes = [16, 8], strides = [1, 1]} : vector<16x24xf32> to vector<16x8xf32>
    %148 = arith.addf %147, %114 : vector<16x8xf32>
    %c1_i32_79 = arith.constant 1 : i32
    %149 = tpu.dynamic_rotate %148 by %c1_i32_79 dim 0 : vector<16x8xf32>, i32 -> vector<16x8xf32>
    %150 = tpu.iota {dimensions = array<i32: 0>} : vector<16x8xi32>
    %c1_i32_80 = arith.constant 1 : i32
    %151 = vector.broadcast %c1_i32_80 : i32 to vector<16x8xi32>
    %152 = arith.cmpi sge, %150, %151 : vector<16x8xi32>
    %cst_81 = arith.constant 0.000000e+00 : f32
    %153 = vector.broadcast %cst_81 : f32 to vector<16x8xf32>
    %154 = arith.select %152, %149, %153 : vector<16x8xi1>, vector<16x8xf32>
    %c14_i32_82 = arith.constant 14 : i32
    %155 = tpu.dynamic_rotate %154 by %c14_i32_82 dim 0 : vector<16x8xf32>, i32 -> vector<16x8xf32>
    %156 = tpu.iota {dimensions = array<i32: 0>} : vector<16x8xi32>
    %c14_i32_83 = arith.constant 14 : i32
    %157 = vector.broadcast %c14_i32_83 : i32 to vector<16x8xi32>
    %158 = arith.cmpi slt, %156, %157 : vector<16x8xi32>
    %cst_84 = arith.constant 0.000000e+00 : f32
    %159 = vector.broadcast %cst_84 : f32 to vector<16x8xf32>
    %160 = arith.select %158, %155, %159 : vector<16x8xi1>, vector<16x8xf32>
    %161 = tpu.concatenate %154, %160, %29 in 1 : vector<16x8xf32>, vector<16x8xf32>, vector<16x8xf32> -> vector<16x24xf32>
    %c3 = arith.constant 3 : index
    %c0_85 = arith.constant 0 : index
    %c0_86 = arith.constant 0 : index
    %162 = vector.load %arg7[%c3, %c0_85, %c0_86] : memref<4x24x16xf32, #tpu.memory_space<vmem>>, vector<1x24x16xf32>
    %163 = vector.shape_cast %162 : vector<1x24x16xf32> to vector<24x16xf32>
    %cst_87 = arith.constant dense<0.000000e+00> : vector<16x16xf32>
    %164 = tpu.matmul %161, %163, %cst_87 {dimension_numbers = #tpu.dot_dimension_numbers<[1], [0], [0], [1], [0, 0, 1, 1], [], []>, precision = #tpu.contract_precision<fp32>} : vector<16x24xf32>, vector<24x16xf32>, vector<16x16xf32> -> vector<16x16xf32>
    %c3_88 = arith.constant 3 : index
    %c0_89 = arith.constant 0 : index
    %c0_90 = arith.constant 0 : index
    %165 = vector.load %arg8[%c3_88, %c0_89, %c0_90] : memref<4x1x16xf32, #tpu.memory_space<vmem>>, vector<1x1x16xf32>
    %166 = vector.shape_cast %165 : vector<1x1x16xf32> to vector<1x16xf32>
    %167 = vector.broadcast %166 : vector<1x16xf32> to vector<16x16xf32>
    %168 = arith.addf %164, %167 : vector<16x16xf32>
    %169 = vector.extract_strided_slice %168 {offsets = [0, 0], sizes = [16, 8], strides = [1, 1]} : vector<16x16xf32> to vector<16x8xf32>
    %170 = math.tanh %169 : vector<16x8xf32>
    %171 = vector.extract_strided_slice %168 {offsets = [0, 8], sizes = [16, 8], strides = [1, 1]} : vector<16x16xf32> to vector<16x8xf32>
    %172 = arith.negf %171 : vector<16x8xf32>
    %173 = math.exp %172 : vector<16x8xf32>
    %cst_91 = arith.constant 1.000000e+00 : f32
    %174 = vector.broadcast %cst_91 : f32 to vector<16x8xf32>
    %175 = arith.addf %174, %173 : vector<16x8xf32>
    %176 = arith.divf %174, %175 : vector<16x8xf32>
    %177 = arith.mulf %170, %176 : vector<16x8xf32>
    %c3_92 = arith.constant 3 : index
    %c0_93 = arith.constant 0 : index
    %c0_94 = arith.constant 0 : index
    %178 = vector.load %arg9[%c3_92, %c0_93, %c0_94] : memref<4x8x24xf32, #tpu.memory_space<vmem>>, vector<1x8x24xf32>
    %179 = vector.shape_cast %178 : vector<1x8x24xf32> to vector<8x24xf32>
    %cst_95 = arith.constant dense<0.000000e+00> : vector<16x24xf32>
    %180 = tpu.matmul %177, %179, %cst_95 {dimension_numbers = #tpu.dot_dimension_numbers<[1], [0], [0], [1], [0, 0, 1, 1], [], []>, precision = #tpu.contract_precision<fp32>} : vector<16x8xf32>, vector<8x24xf32>, vector<16x24xf32> -> vector<16x24xf32>
    %c3_96 = arith.constant 3 : index
    %c0_97 = arith.constant 0 : index
    %c0_98 = arith.constant 0 : index
    %181 = vector.load %arg10[%c3_96, %c0_97, %c0_98] : memref<4x1x24xf32, #tpu.memory_space<vmem>>, vector<1x1x24xf32>
    %182 = vector.shape_cast %181 : vector<1x1x24xf32> to vector<1x24xf32>
    %183 = vector.broadcast %182 : vector<1x24xf32> to vector<16x24xf32>
    %184 = arith.addf %180, %183 : vector<16x24xf32>
    %185 = vector.extract_strided_slice %184 {offsets = [0, 0], sizes = [16, 16], strides = [1, 1]} : vector<16x24xf32> to vector<16x16xf32>
    %c15_i32_99 = arith.constant 15 : i32
    %186 = tpu.dynamic_rotate %146 by %c15_i32_99 dim 0 : vector<16x16xf32>, i32 -> vector<16x16xf32>
    %187 = tpu.iota {dimensions = array<i32: 0>} : vector<16x16xi32>
    %c15_i32_100 = arith.constant 15 : i32
    %188 = vector.broadcast %c15_i32_100 : i32 to vector<16x16xi32>
    %189 = arith.cmpi slt, %187, %188 : vector<16x16xi32>
    %cst_101 = arith.constant 0.000000e+00 : f32
    %190 = vector.broadcast %cst_101 : f32 to vector<16x16xf32>
    %191 = arith.select %189, %186, %190 : vector<16x16xi1>, vector<16x16xf32>
    %192 = arith.addf %185, %191 : vector<16x16xf32>
    %cst_102 = arith.constant 0.000000e+00 : f32
    %193 = vector.broadcast %cst_102 : f32 to vector<16x16xf32>
    %194 = arith.maximumf %192, %193 : vector<16x16xf32>
    %c0_103 = arith.constant 0 : index
    %c0_104 = arith.constant 0 : index
    %195 = vector.load %arg11[%c0_103, %c0_104] : memref<16x16xf32, #tpu.memory_space<vmem>>, vector<16x16xf32>
    %cst_105 = arith.constant dense<0.000000e+00> : vector<16x16xf32>
    %196 = tpu.matmul %194, %195, %cst_105 {dimension_numbers = #tpu.dot_dimension_numbers<[1], [0], [0], [1], [0, 0, 1, 1], [], []>, precision = #tpu.contract_precision<fp32>} : vector<16x16xf32>, vector<16x16xf32>, vector<16x16xf32> -> vector<16x16xf32>
    %c0_106 = arith.constant 0 : index
    %c0_107 = arith.constant 0 : index
    %197 = vector.load %arg12[%c0_106, %c0_107] : memref<1x16xf32, #tpu.memory_space<vmem>>, vector<1x16xf32>
    %198 = vector.broadcast %197 : vector<1x16xf32> to vector<16x16xf32>
    %199 = arith.addf %196, %198 : vector<16x16xf32>
    %cst_108 = arith.constant 0.000000e+00 : f32
    %200 = vector.broadcast %cst_108 : f32 to vector<16x16xf32>
    %201 = arith.maximumf %199, %200 : vector<16x16xf32>
    %c0_109 = arith.constant 0 : index
    %c0_110 = arith.constant 0 : index
    %202 = vector.load %arg13[%c0_109, %c0_110] : memref<16x8xf32, #tpu.memory_space<vmem>>, vector<16x8xf32>
    %cst_111 = arith.constant dense<0.000000e+00> : vector<16x8xf32>
    %203 = tpu.matmul %201, %202, %cst_111 {dimension_numbers = #tpu.dot_dimension_numbers<[1], [0], [0], [1], [0, 0, 1, 1], [], []>, precision = #tpu.contract_precision<fp32>} : vector<16x16xf32>, vector<16x8xf32>, vector<16x8xf32> -> vector<16x8xf32>
    %c0_112 = arith.constant 0 : index
    %c0_113 = arith.constant 0 : index
    %204 = vector.load %arg14[%c0_112, %c0_113] : memref<1x8xf32, #tpu.memory_space<vmem>>, vector<1x8xf32>
    %205 = vector.broadcast %204 : vector<1x8xf32> to vector<16x8xf32>
    %206 = arith.addf %203, %205 : vector<16x8xf32>
    %cst_114 = arith.constant 0.000000e+00 : f32
    %207 = vector.broadcast %cst_114 : f32 to vector<16x8xf32>
    %208 = arith.maximumf %206, %207 : vector<16x8xf32>
    %c0_115 = arith.constant 0 : index
    %c0_116 = arith.constant 0 : index
    %209 = vector.load %arg15[%c0_115, %c0_116] : memref<8x1xf32, #tpu.memory_space<vmem>>, vector<8x1xf32>
    %cst_117 = arith.constant dense<0.000000e+00> : vector<16x1xf32>
    %210 = tpu.matmul %208, %209, %cst_117 {dimension_numbers = #tpu.dot_dimension_numbers<[1], [0], [0], [1], [0, 0, 1, 1], [], []>, precision = #tpu.contract_precision<fp32>} : vector<16x8xf32>, vector<8x1xf32>, vector<16x1xf32> -> vector<16x1xf32>
    %c0_118 = arith.constant 0 : index
    %c0_119 = arith.constant 0 : index
    %211 = vector.load %arg16[%c0_118, %c0_119] : memref<1x1xf32, #tpu.memory_space<vmem>>, vector<1x1xf32>
    %212 = vector.broadcast %211 : vector<1x1xf32> to vector<16x1xf32>
    %213 = arith.addf %210, %212 : vector<16x1xf32>
    %c0_120 = arith.constant 0 : index
    %c0_121 = arith.constant 0 : index
    %214 = vector.load %arg17[%c0_120, %c0_121] : memref<16x1xf32, #tpu.memory_space<vmem>>, vector<16x1xf32>
    tpu.vector_store %arg17[%c0_120, %c0_121], %213 {strides = array<i32>} : memref<16x1xf32, #tpu.memory_space<vmem>>, vector<16x1xf32>,
    return
  }
}

</mosaic_0001>

<bundles_post_ra>
// kernel: forward.1
= control target key start
LH: loop header
LB: loop body
LE: loop exit
PB: predicated region body
PF: predicated region fallthrough
CT: control target
= control target key end

     0   :  { %vm578_vm0 = vcmask 1043456   ;;  %vm571_vm1 = vcmask 31744   ;;  %vm75_vm2 = vcmask 1040384   ;;  %vm68_vm3 = vcmask 7168   ;;  %s8836_s30 = smov 16   ;;  %s8837_s21 = smov 120   ;;  %s9383_s4 = inlined_call_operand.vmem [shape: f32[4,8], index: 4, kind: input, shape index: {}]   ;;  %s9384_s1 = inlined_call_operand.vmem [shape: f32[16,4], index: 1, kind: input, shape index: {}]   ;;  %s9385_s2 = inlined_call_operand.vmem [shape: f32[1,8], index: 2, kind: input, shape index: {}]   ;;  %s9386_s0 = inlined_call_operand.vmem [shape: f32[16,1], index: 0, kind: input, shape index: {}]   ;;  %s9387_s5 = inlined_call_operand.vmem [shape: f32[8,8], index: 5, kind: input, shape index: {}]   ;;  %s9388_s3 = inlined_call_operand.vmem [shape: f32[1,8], index: 3, kind: input, shape index: {}]   ;;  %s9389_s6 = inlined_call_operand.vmem [shape: f32[1,8], index: 6, kind: input, shape index: {}]   ;;  %s9390_s7 = inlined_call_operand.vmem [shape: f32[4,24,16], index: 7, kind: input, shape index: {}]   ;;  %s9391_s8 = inlined_call_operand.vmem [shape: f32[4,1,16], index: 8, kind: input, shape index: {}]   ;;  %s9392_s9 = inlined_call_operand.vmem [shape: f32[4,8,24], index: 9, kind: input, shape index: {}]   ;;  %s9393_s10 = inlined_call_operand.vmem [shape: f32[4,1,24], index: 10, kind: input, shape index: {}]   ;;  %s9394_s11 = inlined_call_operand.vmem [shape: f32[16,16], index: 11, kind: input, shape index: {}]   ;;  %s9395_s13 = inlined_call_operand.vmem [shape: f32[16,8], index: 13, kind: input, shape index: {}]   ;;  %s9396_s12 = inlined_call_operand.vmem [shape: f32[1,16], index: 12, kind: input, shape index: {}]   ;;  %s9397_s15 = inlined_call_operand.vmem [shape: f32[8,1], index: 15, kind: input, shape index: {}]   ;;  %s9398_s16 = inlined_call_operand.<no memory space> [shape: f32[1,1], index: 16, kind: input, shape index: {}]   ;;  %s9399_s14 = inlined_call_operand.vmem [shape: f32[1,8], index: 14, kind: input, shape index: {}]   ;;  %s9400_s17 = inlined_call_operand.vmem [shape: f32[16,1], index: 17, kind: output, shape index: {}]  }
   0x1   :  { %9402 = sst [smem:[#allocation3_spill]] %s9383_s4  ;;  %v60_v6 = vld [vmem:[%s9385_s2] sm:$0x1]  ;;  %v59_v12 = vld [vmem:[%s9386_s0 + $0x8] sm:$0xff]  ;;  %v1601_v48 = vlaneseq  ;;  %vm1091_vm6 = vcmask 64512   ;;  %vm1629_vm11 = vcmask 130048  }
   0x2   :  { %9403 = sst [smem:[#allocation4_spill]] %s9384_s1  ;;  %s9404_s26 = sld [smem:[#allocation3_spill]]  ;;  %v58_v7 = vld [vmem:[%s9386_s0] sm:$0xff]  ;;  %v77_v11 = vsel %vm75_vm2, %v60_v6, 0  ;;  %v73_v15 = vsel %vm68_vm3, %v59_v12, 0  ;;  %vm1642_vm12 = vcmask 195584  }
   0x3   :  { %s9405_s29 = sld [smem:[#allocation4_spill]]  ;;  %v8953_v13 = vand.u32 4294901760, %v77_v11  ;;  %v70_v14 = vsel %vm68_vm3, %v58_v7, 0  ;;  %v8965_v20 = vand.u32 4294901760, %v73_v15  ;;  %v1083_v42 = vld [vmem:[%s9387_s5] sm:$0xff]  ;;  %v9005_v54 = vshrl.u32 %v1601_v48, 7 }
   0x4   :  { %v8961_v19 = vand.u32 4294901760, %v70_v14  ;;  %v8994_v43 = vand.u32 4294901760, %v1083_v42  ;;  %v7570_v52 = vld [vmem:[%s9388_s3] ss:$0 sm:$0xff]  ;;  %s8835_s3 = smov 8   ;;  %s8838_s2 = smov 112  }
   0x5   :  { %7925 = vmatprep.subr.mxu0 %v8953_v13  ;;  %v167_v21 = vsub.f32 %v77_v11, %v8953_v13  ;;  %v156_v26 = vsub.f32 %v73_v15, %v8965_v20  ;;  %v9010_v60 = vadd.s32 8, %v9005_v54  ;;  %vm1603_vm4 = vcmp.lt.s32.totalorder %v9005_v54, 7 }
   0x6   :  { %7926 = vmatpush3.msra.mxu0 %v8953_v13  ;;  %v146_v25 = vsub.f32 %v70_v14, %v8961_v19  ;;  %v1186_v44 = vsub.f32 %v1083_v42, %v8994_v43  ;;  %vm2709_vm13 = vcmp.lt.s32.totalorder %v9005_v54, 1  ;;  %vm2712_vm14 = vcmp.ge.s32.totalorder %v9005_v54, 1 }
   0x7   :  { %v168_v27 = vand.u32 4294901760, %v167_v21  ;;  %v157_v32 = vand.u32 4294901760, %v156_v26  ;;  %vm1608_vm5 = vcmp.lt.s32.totalorder %v9010_v60, 15  ;;  %vm2718_vm15 = vcmp.lt.s32.totalorder %v9005_v54, 6 }
   0x8   :  { %v570_v0 = vld [vmem:[%s9404_s26] sm:$0xf]  ;;  %v147_v31 = vand.u32 4294901760, %v146_v25  ;;  %v8999_v45 = vand.u32 4294901760, %v1186_v44 }
   0x9   :  { %v568_v1 = vld [vmem:[%s9405_s29] sm:$0xff]  ;;  %v569_v2 = vld [vmem:[%s9405_s29 + $0x8] sm:$0xff]  ;;  %v580_v3 = vsel %vm578_vm0, %v570_v0, 0  ;;  %v169_v33 = vsub.f32 %v167_v21, %v168_v27  ;;  %v158_v38 = vsub.f32 %v156_v26, %v157_v32  ;;  %vm2722_vm0 = vcmp.lt.s32.totalorder %v9010_v60, 14 }
   0xa   :  { %v573_v4 = vsel %vm571_vm1, %v568_v1, 0  ;;  %v576_v5 = vsel %vm571_vm1, %v569_v2, 0  ;;  %v8944_v8 = vand.u32 4294901760, %v580_v3  ;;  %v148_v37 = vsub.f32 %v146_v25, %v147_v31 }
   0xb   :  { %v8946_v9 = vand.u32 4294901760, %v573_v4  ;;  %v8948_v10 = vand.u32 4294901760, %v576_v5  ;;  %v170_v39 = vand.u32 4294901760, %v169_v33  ;;  %v159_v41 = vand.u32 4294901760, %v158_v38 }
   0xc   :  { %7955 = vmatprep.subr.mxu1 %v8944_v8  ;;  %v670_v17 = vsub.f32 %v580_v3, %v8944_v8  ;;  %v149_v40 = vand.u32 4294901760, %v148_v37  ;;  %v1188_v46 = vsub.f32 %v1186_v44, %v8999_v45 }
   0xd   :  { %v649_v16 = vsub.f32 %v573_v4, %v8946_v9  ;;  %v659_v18 = vsub.f32 %v576_v5, %v8948_v10  ;;  %7956 = vmatpush3.msra.mxu1 %v8944_v8  ;;  %7930 = vmatprep.subr.mxu0 %v170_v39 }
   0xe   :  { %v671_v23 = vand.u32 4294901760, %v670_v17  ;;  %7927 = vmatprep.mubr.f32.mxu0 %v149_v40  ;;  %v1189_v47 = vand.u32 4294901760, %v1188_v46 }
   0xf   :  { %v650_v22 = vand.u32 4294901760, %v649_v16  ;;  %v660_v24 = vand.u32 4294901760, %v659_v18  ;;  %7928 = vmatmul.mubr.f32.vlgmr.msra.gmra.mrb[0].mxu0 %v159_v41 }
  0x10   :  { %v672_v29 = vsub.f32 %v670_v17, %v671_v23  ;;  %7931 = vmatpush3.msra.mxu0 %v170_v39  ;;  %7932 = vmatprep.mubr.f32.mxu0 %v8961_v19 }
  0x11   :  { %v651_v28 = vsub.f32 %v649_v16, %v650_v22  ;;  %v661_v30 = vsub.f32 %v659_v18, %v660_v24  ;;  %7935 = vmatprep.subr.mxu0 %v167_v21 }
  0x12   :  { %v673_v35 = vand.u32 4294901760, %v672_v29 }
  0x13   :  { %v652_v34 = vand.u32 4294901760, %v651_v28  ;;  %v662_v36 = vand.u32 4294901760, %v661_v30  ;;  %v1632_v30 = vld [vmem:[%s9390_s7] sm:$0xff] }
  0x14   :  { %7960 = vmatprep.subr.mxu1 %v673_v35 }
  0x15   :  { %7957 = vmatprep.mubr.f32.mxu1 %v652_v34 }
  0x16   :  { %7958 = vmatmul.mubr.f32.vlgmr.msra.gmra.mrb[0].mxu1 %v662_v36 }
  0x17   :  { %7961 = vmatpush3.msra.mxu1 %v673_v35  ;;  %7962 = vmatprep.mubr.f32.mxu1 %v8946_v9 }
  0x18   :  { %7965 = vmatprep.subr.mxu1 %v670_v17  ;;  %7933 = vmatmul.mubr.f32.vlgmr.msra.gmra.mrb[0].mxu0 %v8965_v20 }
  0x19   :  { %7936 = vmatpush3.msra.mxu0 %v167_v21  ;;  %7937 = vmatprep.mubr.f32.mxu0 %v146_v25  ;;  %v7573_v21 = vld [vmem:[%s9389_s6] ss:$0 sm:$0xff] }
  0x1a   :  { %7940 = vmatprep.subr.mxu0 %v8953_v13 }
  0x1e   :  { %7963 = vmatmul.mubr.f32.vlgmr.msra.gmra.mrb[0].mxu1 %v8948_v10 }
  0x1f   :  { %7966 = vmatpush3.msra.mxu1 %v670_v17  ;;  %7967 = vmatprep.mubr.f32.mxu1 %v649_v16 }
  0x20   :  { %7970 = vmatprep.subr.mxu1 %v8944_v8  ;;  %7938 = vmatmul.mubr.f32.vlgmr.msra.gmra.mrb[0].mxu0 %v156_v26 }
  0x21   :  { %7941 = vmatpush3.msra.mxu0 %v8953_v13  ;;  %7942 = vmatprep.mubr.f32.mxu0 %v147_v31  ;;  %v1633_v31 = vld [vmem:[%s9390_s7 + $0x8] sm:$0xff] }
  0x22   :  { %7945 = vmatprep.subr.mxu0 %v168_v27  ;;  %v1653_v33 = vand.u32 4294901760, %v1633_v31 }
  0x24   :  { %v1746_v37 = vsub.f32 %v1633_v31, %v1653_v33 }
  0x26   :  { %7968 = vmatmul.mubr.f32.vlgmr.msra.gmra.mrb[0].mxu1 %v659_v18  ;;  %v1747_v41 = vand.u32 4294901760, %v1746_v37 }
  0x27   :  { %7971 = vmatpush3.msra.mxu1 %v8944_v8  ;;  %7972 = vmatprep.mubr.f32.mxu1 %v650_v22 }
  0x28   :  { %7975 = vmatprep.subr.mxu1 %v671_v23  ;;  %7943 = vmatmul.mubr.f32.vlgmr.msra.gmra.mrb[0].mxu0 %v157_v32  ;;  %v1650_v32 = vand.u32 4294901760, %v1632_v30 }
  0x29   :  { %7946 = vmatpush3.msra.mxu0 %v168_v27  ;;  %7947 = vmatprep.mubr.f32.mxu0 %v8961_v19 }
  0x2a   :  { %7950 = vmatprep.subr.mxu0 %v8953_v13  ;;  %v9049_v35 = vpack.c.bf16 %v1653_v33, %v1650_v32  ;;  %v1739_v36 = vsub.f32 %v1632_v30, %v1650_v32 }
  0x2c   :  { %v1740_v40 = vand.u32 4294901760, %v1739_v36 }
  0x2e   :  { %7973 = vmatmul.mubr.f32.vlgmr.msra.gmra.mrb[0].mxu1 %v660_v24  ;;  %v1741_v46 = vsub.f32 %v1739_v36, %v1740_v40 }
  0x2f   :  { %7976 = vmatpush3.msra.mxu1 %v671_v23  ;;  %7977 = vmatprep.mubr.f32.mxu1 %v8946_v9 }
  0x30   :  { %7980 = vmatprep.subr.mxu1 %v8944_v8  ;;  %7948 = vmatmul.mubr.f32.vlgmr.msra.gmra.mrb[0].mxu0 %v8965_v20  ;;  %v1742_v48 = vand.u32 4294901760, %v1741_v46 }
  0x31   :  { %7951 = vmatpush3.msra.mxu0 %v8953_v13  ;;  %7952 = vmatprep.mubr.f32.mxu0 %v8961_v19 }
  0x32   :  { %7985 = vmatprep.subr.mxu0 %v8994_v43 }
  0x36   :  { %7978 = vmatmul.mubr.f32.vlgmr.msra.gmra.mrb[0].mxu1 %v8948_v10 }
  0x37   :  { %7981 = vmatpush3.msra.mxu1 %v8944_v8  ;;  %7982 = vmatprep.mubr.f32.mxu1 %v8946_v9 }
  0x38   :  { %7953 = vmatmul.mubr.f32.vlgmr.msra.gmra.mrb[0].mxu0 %v8965_v20  ;;  %8466 = vmatprep.subr.bf16.mxu1 %v9049_v35 }
  0x39   :  { %7986 = vmatpush3.msra.mxu0 %v8994_v43 }
  0x3a   :  { %7990 = vmatprep.subr.mxu0 %v1189_v47 }
  0x3e   :  { %7983 = vmatmul.mubr.f32.vlgmr.msra.gmra.mrb[0].mxu1 %v8948_v10 }
  0x3f   :  { %8468 = vmatpush3.bf16.msra.mxu1 %v9049_v35 }
 0x10b   :  { %v7954_v56 = vpop.f32.mrb[0].mxu0 }
 0x10c   :  { %v9007_v58 = vadd.f32 %v7954_v56, %v7570_v52  ;;  %v558_v59 = vpop.f32.mrb[1].mxu0 }
 0x10d   :  { %v9012_v61 = vadd.f32 %v7570_v52, %v558_v59  ;;  %v8473_v52 = vpack.c.bf16 %v1746_v37, %v1739_v36 }
 0x10e   :  { %v1600_v62 = vrot.slane %v9007_v58, 1 }
 0x10f   :  { %v1599_v63 = vrot.slane %v9012_v61, 1 }
 0x111   :  { %v7984_v49 = vpop.f32.mrb[0].mxu1  ;;  %v9020_v0 = vsel %vm1603_vm4, %v1599_v63, %v1600_v62  ;;  %v1605_v1 = vsel %vm1603_vm4, %v1600_v62, %v1599_v63 }
 0x112   :  { %v1074_v50 = vmin.f32 %v7984_v49, 0.0  ;;  %v1061_v51 = vpop.f32.mrb[1].mxu1  ;;  %1613 = vrot.lane.b32.xlu0 %v9020_v0, %s8835_s3  ;;  %v9028_v2 = vsel %vm1608_vm5, %v1605_v1, 0.0  ;;  %vm1072_vm7 = vcmp.gt.f32.partialorder %v7984_v49, 0.0 }
 0x113   :  { %v1073_v53 = vmin.f32 %v1061_v51, 0.0  ;;  %vm1071_vm8 = vcmp.gt.f32.partialorder %v1061_v51, 0.0 }
 0x114   :  { %v1077_v55 = vmul.f32 1.442695, %v1074_v50 }
 0x115   :  { %v1075_v57 = vmul.f32 1.442695, %v1073_v53  ;;  %v8481_v53 = vpack.c.bf16 %v1747_v41, %v1740_v40 }
 0x116   :  { %8779 = vpow2.f32 %v1077_v55  ;;  %1615 = vrot.lane.b32.xlu0 %v9028_v2, %s8835_s3 }
 0x117   :  { %8781 = vpow2.f32 %v1075_v57 }
 0x120   :  { %v8780_v3 = vpop.eup %8779 }
 0x121   :  { %v8782_v4 = vpop.eup %8781  ;;  %v7572_v5 = vadd.f32 -1.0, %v8780_v3 }
 0x122   :  { %v7571_v6 = vadd.f32 -1.0, %v8782_v4 }
 0x123   :  { %v1082_v7 = vsel %vm1072_vm7, %v7984_v49, %v7572_v5 }
 0x124   :  { %v1096_v8 = vsel %vm1091_vm6, %v1082_v7, 0  ;;  %v1081_v9 = vsel %vm1071_vm8, %v1061_v51, %v7571_v6 }
 0x125   :  { %v1174_v10 = vand.u32 4294901760, %v1096_v8  ;;  %v1093_v11 = vsel %vm1091_vm6, %v1081_v9, 0 }
 0x126   :  { %v1164_v12 = vand.u32 4294901760, %v1093_v11 }
 0x127   :  { %v1175_v13 = vsub.f32 %v1096_v8, %v1174_v10 }
 0x128   :  { %v1165_v14 = vsub.f32 %v1093_v11, %v1164_v12 }
 0x129   :  { %v1176_v15 = vand.u32 4294901760, %v1175_v13 }
 0x12a   :  { %v1166_v16 = vand.u32 4294901760, %v1165_v14 }
 0x12b   :  { %v1177_v17 = vsub.f32 %v1175_v13, %v1176_v15 }
 0x12c   :  { %v1167_v18 = vsub.f32 %v1165_v14, %v1166_v16 }
 0x12d   :  { %v1178_v20 = vand.u32 4294901760, %v1177_v17 }
 0x12e   :  { %v1168_v19 = vand.u32 4294901760, %v1167_v18  ;;  %v7576_v18 = vld [vmem:[%s9391_s8] ss:$0 sm:$0xff] }
 0x130   :  { %7987 = vmatprep.mubr.f32.mxu0 %v1168_v19 }
 0x131   :  { %7988 = vmatmul.mubr.f32.vlgmr.msra.gmra.mrb[2].mxu0 %v1178_v20 }
 0x132   :  { %7991 = vmatpush3.msra.mxu0 %v1189_v47  ;;  %7992 = vmatprep.mubr.f32.mxu0 %v1164_v12  ;;  %v1748_v47 = vsub.f32 %v1746_v37, %v1747_v41 }
 0x133   :  { %7995 = vmatprep.subr.mxu0 %v1186_v44 }
 0x134   :  { %v1749_v49 = vand.u32 4294901760, %v1748_v47 }
 0x136   :  { %v8469_v51 = vpack.c.bf16 %v1749_v49, %v1742_v48 }
 0x139   :  { %7993 = vmatmul.mubr.f32.vlgmr.msra.gmra.mrb[2].mxu0 %v1174_v10 }
 0x13a   :  { %7996 = vmatpush3.msra.mxu0 %v1186_v44  ;;  %7997 = vmatprep.mubr.f32.mxu0 %v1165_v14 }
 0x13b   :  { %8000 = vmatprep.subr.mxu0 %v8994_v43 }
 0x141   :  { %7998 = vmatmul.mubr.f32.vlgmr.msra.gmra.mrb[2].mxu0 %v1175_v13 }
 0x142   :  { %8001 = vmatpush3.msra.mxu0 %v8994_v43  ;;  %8002 = vmatprep.mubr.f32.mxu0 %v1166_v16 }
 0x143   :  { %8005 = vmatprep.subr.mxu0 %v8999_v45 }
 0x149   :  { %8003 = vmatmul.mubr.f32.vlgmr.msra.gmra.mrb[2].mxu0 %v1176_v15 }
 0x14a   :  { %8006 = vmatpush3.msra.mxu0 %v8999_v45  ;;  %8007 = vmatprep.mubr.f32.mxu0 %v1164_v12 }
 0x14b   :  { %8010 = vmatprep.subr.mxu0 %v8994_v43 }
 0x151   :  { %8008 = vmatmul.mubr.f32.vlgmr.msra.gmra.mrb[2].mxu0 %v1174_v10 }
 0x152   :  { %8011 = vmatpush3.msra.mxu0 %v8994_v43  ;;  %8012 = vmatprep.mubr.f32.mxu0 %v1164_v12  ;;  %v1634_v43 = vld [vmem:[%s9390_s7 + $0x10] sm:$0xff] }
 0x153   :  { %v9056_v45 = vand.u32 4294901760, %v1634_v43 }
 0x155   :  { %8019 = vmatprep.subr.mxu1 %v9056_v45  ;;  %v1753_v3 = vsub.f32 %v1634_v43, %v9056_v45 }
 0x156   :  { %8020 = vmatpush3.msra.mxu1 %v9056_v45 }
 0x157   :  { %8470 = vmatprep.subr.bf16.mxu1 %v8469_v51 }
 0x159   :  { %8013 = vmatmul.mubr.f32.vlgmr.msra.gmra.mrb[2].mxu0 %v1174_v10  ;;  %v1754_v10 = vand.u32 4294901760, %v1753_v3 }
 0x15b   :  { %v1755_v15 = vsub.f32 %v1753_v3, %v1754_v10 }
 0x184   :  { %v1614_v55 = vpop.permute.xlu0 %1613 }
 0x185   :  { %v1627_v56 = vsel %vm1091_vm6, %v9012_v61, %v1614_v55 }
 0x188   :  { %v1616_v59 = vpop.permute.xlu0 %1615 }
 0x189   :  { %v1628_v4 = vsel %vm1091_vm6, %v9007_v58, %v1616_v59  ;;  %v1756_v58 = vand.u32 4294901760, %v1755_v15 }
 0x22c   :  { %v8014_v22 = vpop.f32.mrb[2].mxu0 }
 0x22d   :  { %v8611_v23 = vadd.f32 %v8014_v22, %v7573_v21  ;;  %v1577_v24 = vpop.f32.mrb[3].mxu0 }
 0x22e   :  { %v8612_v25 = vadd.f32 %v7573_v21, %v1577_v24 }
 0x22f   :  { %v1590_v26 = vmin.f32 %v8611_v23, 0.0  ;;  %vm1588_vm10 = vcmp.gt.f32.partialorder %v8611_v23, 0.0 }
 0x230   :  { %v1589_v27 = vmin.f32 %v8612_v25, 0.0  ;;  %vm1587_vm9 = vcmp.gt.f32.partialorder %v8612_v25, 0.0 }
 0x231   :  { %v1593_v28 = vmul.f32 1.442695, %v1590_v26 }
 0x232   :  { %v1591_v29 = vmul.f32 1.442695, %v1589_v27 }
 0x233   :  { %8783 = vpow2.f32 %v1593_v28 }
 0x234   :  { %8785 = vpow2.f32 %v1591_v29  ;;  %v2188_v29 = vld [vmem:[%s9392_s9] sm:$0xff] }
 0x235   :  { %v2203_v30 = vand.u32 4294901760, %v2188_v29 }
 0x237   :  { %8069 = vmatprep.subr.mxu0 %v2203_v30  ;;  %v2290_v33 = vsub.f32 %v2188_v29, %v2203_v30 }
 0x238   :  { %8070 = vmatpush3.msra.mxu0 %v2203_v30 }
 0x23d   :  { %v8784_v34 = vpop.eup %8783 }
 0x23e   :  { %v8786_v38 = vpop.eup %8785  ;;  %v7575_v42 = vadd.f32 -1.0, %v8784_v34  ;;  %v2291_v34 = vand.u32 4294901760, %v2290_v33 }
 0x23f   :  { %v7574_v39 = vadd.f32 -1.0, %v8786_v38 }
 0x240   :  { %v1598_v50 = vsel %vm1588_vm10, %v8611_v23, %v7575_v42 }
 0x241   :  { %v1597_v44 = vsel %vm1587_vm9, %v8612_v25, %v7574_v39 }
 0x242   :  { %1621 = vrot.lane.b32.xlu1 %v1597_v44, %s8836_s30 }
 0x246   :  { %1623 = vrot.lane.b32.xlu1 %v1598_v50, %s8836_s30 }
 0x2b4   :  { %v9064_v57 = vpop.permute.xlu1 %1621 }
 0x2b5   :  { %v1630_v62 = vsel %vm1629_vm11, %v1627_v56, %v9064_v57 }
 0x2b6   :  { %v1644_v63 = vsel %vm1642_vm12, %v1630_v62, 0 }
 0x2b7   :  { %v1717_v1 = vand.u32 4294901760, %v1644_v63 }
 0x2b8   :  { %v9072_v5 = vpop.permute.xlu1 %1623 }
 0x2b9   :  { %v1718_v6 = vsub.f32 %v1644_v63, %v1717_v1  ;;  %v1631_v61 = vsel %vm1629_vm11, %v1628_v4, %v9072_v5 }
 0x2ba   :  { %v1647_v7 = vsel %vm1642_vm12, %v1631_v61, 0 }
 0x2bb   :  { %v1727_v8 = vand.u32 4294901760, %v1647_v7  ;;  %v1719_v9 = vand.u32 4294901760, %v1718_v6 }
 0x2bd   :  { %v1728_v11 = vsub.f32 %v1647_v7, %v1727_v8  ;;  %v1720_v12 = vsub.f32 %v1718_v6, %v1719_v9 }
 0x2bf   :  { %v1721_v13 = vand.u32 4294901760, %v1720_v12  ;;  %v1729_v14 = vand.u32 4294901760, %v1728_v11 }
 0x2c1   :  { %8021 = vmatprep.mubr.f32.mxu1 %v1721_v13  ;;  %v1730_v16 = vsub.f32 %v1728_v11, %v1729_v14 }
 0x2c3   :  { %v1731_v17 = vand.u32 4294901760, %v1730_v16 }
 0x2c5   :  { %8022 = vmatmul.mubr.f32.vlgmr.msra.gmra.mrb[2].mxu1 %v1731_v17 }
 0x2c6   :  { %8472 = vmatpush3.bf16.msra.mxu1 %v8469_v51  ;;  %8030 = vmatprep.mubr.f32.mxu1 %v1717_v1 }
 0x2c7   :  { %8028 = vmatprep.subr.mxu1 %v1756_v58 }
 0x2ca   :  { %8029 = vmatpush3.msra.mxu1 %v1756_v58  ;;  %v7582_v58 = vld [vmem:[%s9390_s7 + $0x28] sm:$0xff] }
 0x2cb   :  { %8474 = vmatprep.subr.bf16.mxu1 %v8473_v52 }
 0x2cd   :  { %8031 = vmatmul.mubr.f32.vlgmr.msra.gmra.mrb[2].mxu1 %v1727_v8 }
 0x2ce   :  { %8476 = vmatpush3.bf16.msra.mxu1 %v8473_v52  ;;  %8039 = vmatprep.mubr.f32.mxu1 %v1718_v6 }
 0x2cf   :  { %8037 = vmatprep.subr.mxu1 %v1753_v3 }
 0x2d2   :  { %8038 = vmatpush3.msra.mxu1 %v1753_v3 }
 0x2d3   :  { %8478 = vmatprep.subr.bf16.mxu1 %v9049_v35 }
 0x2d5   :  { %8040 = vmatmul.mubr.f32.vlgmr.msra.gmra.mrb[2].mxu1 %v1728_v11 }
 0x2d6   :  { %8480 = vmatpush3.bf16.msra.mxu1 %v9049_v35  ;;  %8048 = vmatprep.mubr.f32.mxu1 %v1719_v9  ;;  %v7580_v9 = vld [vmem:[%s9390_s7 + $0x18] sm:$0xff] }
 0x2d7   :  { %8046 = vmatprep.subr.mxu1 %v9056_v45  ;;  %v2756_v12 = vand.u32 4294901760, %v7580_v9 }
 0x2da   :  { %8047 = vmatpush3.msra.mxu1 %v9056_v45 }
 0x2db   :  { %8482 = vmatprep.subr.bf16.mxu1 %v8481_v53 }
 0x2dd   :  { %8049 = vmatmul.mubr.f32.vlgmr.msra.gmra.mrb[2].mxu1 %v1729_v14 }
 0x2de   :  { %8484 = vmatpush3.bf16.msra.mxu1 %v8481_v53  ;;  %8057 = vmatprep.mubr.f32.mxu1 %v1717_v1  ;;  %v7579_v53 = vld [vmem:[%s9393_s10] ss:$0 sm:$0xff] }
 0x2df   :  { %8055 = vmatprep.subr.mxu1 %v1754_v10 }
 0x2e2   :  { %8056 = vmatpush3.msra.mxu1 %v1754_v10  ;;  %v7581_v10 = vld [vmem:[%s9390_s7 + $0x20] sm:$0xff] }
 0x2e3   :  { %8486 = vmatprep.subr.bf16.mxu1 %v9049_v35  ;;  %v2759_v13 = vand.u32 4294901760, %v7581_v10 }
 0x2e5   :  { %8058 = vmatmul.mubr.f32.vlgmr.msra.gmra.mrb[2].mxu1 %v1727_v8  ;;  %v9120_v17 = vpack.c.bf16 %v2759_v13, %v2756_v12 }
 0x2e6   :  { %8488 = vmatpush3.bf16.msra.mxu1 %v9049_v35  ;;  %8066 = vmatprep.mubr.f32.mxu1 %v1717_v1  ;;  %v2292_v35 = vsub.f32 %v2290_v33, %v2291_v34 }
 0x2e7   :  { %8064 = vmatprep.subr.mxu1 %v9056_v45 }
 0x2e8   :  { %v2293_v36 = vand.u32 4294901760, %v2292_v35 }
 0x2ea   :  { %8065 = vmatpush3.msra.mxu1 %v9056_v45  ;;  %8074 = vmatprep.subr.mxu0 %v2293_v36 }
 0x2eb   :  { %8490 = vmatprep.subr.bf16.mxu1 %v9120_v17 }
 0x2ed   :  { %8067 = vmatmul.mubr.f32.vlgmr.msra.gmra.mrb[2].mxu1 %v1727_v8 }
 0x2ee   :  { %8492 = vmatpush3.bf16.msra.mxu1 %v9120_v17 }
 0x3c0   :  { %v8068_v19 = vpop.f32.mrb[2].mxu1 }
 0x3c1   :  { %v8613_v20 = vadd.f32 %v8068_v19, %v7576_v18  ;;  %v2154_v21 = vpop.f32.mrb[3].mxu1  ;;  %v2852_v19 = vsub.f32 %v7581_v10, %v2759_v13 }
 0x3c2   :  { %v8614_v22 = vadd.f32 %v7576_v18, %v2154_v21  ;;  %v2845_v18 = vsub.f32 %v7580_v9, %v2756_v12 }
 0x3c3   :  { %v7578_v23 = vmul.f32 -1.442695, %v8613_v20 }
 0x3c4   :  { %v7577_v24 = vmul.f32 -1.442695, %v8614_v22 }
 0x3c5   :  { %8787 = vpow2.f32 %v7578_v23  ;;  %v2846_v23 = vand.u32 4294901760, %v2845_v18 }
 0x3c6   :  { %8789 = vpow2.f32 %v7577_v24  ;;  %v2853_v24 = vand.u32 4294901760, %v2852_v19 }
 0x3c8   :  { %v2854_v29 = vsub.f32 %v2852_v19, %v2853_v24 }
 0x3cf   :  { %v8788_v25 = vpop.eup %8787 }
 0x3d0   :  { %v8790_v26 = vpop.eup %8789  ;;  %v2173_v27 = vadd.f32 1.0, %v8788_v25 }
 0x3d1   :  { %v2172_v28 = vadd.f32 1.0, %v8790_v26 }
 0x3d2   :  { %8791 = vrcp.f32 %v2173_v27 }
 0x3d3   :  { %8793 = vrcp.f32 %v2172_v28  ;;  %v2847_v28 = vsub.f32 %v2845_v18, %v2846_v23 }
 0x3d4   :  { %8795 = vtanh.f32 %v8613_v20  ;;  %v9125_v20 = vand.u32 4294901760, %v7582_v58 }
 0x3d5   :  { %8797 = vtanh.f32 %v8614_v22 }
 0x3d6   :  { %8103 = vmatprep.subr.mxu1 %v9125_v20 }
 0x3d7   :  { %8104 = vmatpush3.msra.mxu1 %v9125_v20 }
 0x3dc   :  { %v8792_v31 = vpop.eup %8791 }
 0x3dd   :  { %v8794_v32 = vpop.eup %8793  ;;  %2182 = vrot.lane.b32.xlu1 %v8792_v31, %s8837_s21 }
 0x3de   :  { %2180 = vrot.lane.b32.xlu0 %v8794_v32, %s8837_s21  ;;  %v8796_v37 = vpop.eup %8795  ;;  %v2848_v32 = vand.u32 4294901760, %v2847_v28 }
 0x3df   :  { %v8798_v39 = vpop.eup %8797 }
 0x3e1   :  { %2693 = vrot.lane.b32.xlu1 %v9028_v2, %s8836_s30 }
 0x3e2   :  { %2691 = vrot.lane.b32.xlu0 %v9020_v0, %s8836_s30 }
 0x44f   :  { %v2183_v38 = vpop.permute.xlu1 %2182 }
 0x450   :  { %v2187_v40 = vmul.f32 %v8796_v37, %v2183_v38  ;;  %v2181_v41 = vpop.permute.xlu0 %2180  ;;  %v8505_v37 = vpack.c.bf16 %v2853_v24, %v2846_v23 }
 0x451   :  { %v2186_v42 = vmul.f32 %v8798_v39, %v2181_v41  ;;  %v2859_v41 = vsub.f32 %v7582_v58, %v9125_v20 }
 0x452   :  { %v2200_v43 = vsel %vm1091_vm6, %v2187_v40, 0 }
 0x453   :  { %v2278_v44 = vand.u32 4294901760, %v2200_v43  ;;  %v2197_v45 = vsel %vm1091_vm6, %v2186_v42, 0  ;;  %v2694_v62 = vpop.permute.xlu1 %2693 }
 0x454   :  { %v2268_v2 = vand.u32 4294901760, %v2197_v45  ;;  %v2692_v1 = vpop.permute.xlu0 %2691 }
 0x455   :  { %v2279_v46 = vsub.f32 %v2200_v43, %v2278_v44 }
 0x456   :  { %v2269_v47 = vsub.f32 %v2197_v45, %v2268_v2 }
 0x457   :  { %v2280_v48 = vand.u32 4294901760, %v2279_v46 }
 0x458   :  { %v2270_v0 = vand.u32 4294901760, %v2269_v47 }
 0x459   :  { %v2281_v49 = vsub.f32 %v2279_v46, %v2280_v48 }
 0x45a   :  { %v2271_v50 = vsub.f32 %v2269_v47, %v2270_v0 }
 0x45b   :  { %v2282_v52 = vand.u32 4294901760, %v2281_v49 }
 0x45c   :  { %v2272_v51 = vand.u32 4294901760, %v2271_v50 }
 0x45e   :  { %8071 = vmatprep.mubr.f32.mxu0 %v2272_v51 }
 0x45f   :  { %8072 = vmatmul.mubr.f32.vlgmr.msra.gmra.mrb[4].mxu0 %v2282_v52 }
 0x460   :  { %8075 = vmatpush3.msra.mxu0 %v2293_v36  ;;  %8076 = vmatprep.mubr.f32.mxu0 %v2268_v2  ;;  %v8497_v36 = vpack.c.bf16 %v2852_v19, %v2845_v18 }
 0x461   :  { %8079 = vmatprep.subr.mxu0 %v2290_v33 }
 0x467   :  { %8077 = vmatmul.mubr.f32.vlgmr.msra.gmra.mrb[4].mxu0 %v2278_v44 }
 0x468   :  { %8080 = vmatpush3.msra.mxu0 %v2290_v33  ;;  %8081 = vmatprep.mubr.f32.mxu0 %v2269_v47  ;;  %v2855_v33 = vand.u32 4294901760, %v2854_v29 }
 0x469   :  { %8084 = vmatprep.subr.mxu0 %v2203_v30 }
 0x46a   :  { %v8493_v35 = vpack.c.bf16 %v2855_v33, %v2848_v32 }
 0x46c   :  { %8494 = vmatprep.subr.bf16.mxu1 %v8493_v35 }
 0x46f   :  { %8082 = vmatmul.mubr.f32.vlgmr.msra.gmra.mrb[4].mxu0 %v2279_v46 }
 0x470   :  { %8085 = vmatpush3.msra.mxu0 %v2203_v30  ;;  %8086 = vmatprep.mubr.f32.mxu0 %v2270_v0 }
 0x471   :  { %8089 = vmatprep.subr.mxu0 %v2291_v34 }
 0x477   :  { %8087 = vmatmul.mubr.f32.vlgmr.msra.gmra.mrb[4].mxu0 %v2280_v48  ;;  %v2860_v48 = vand.u32 4294901760, %v2859_v41 }
 0x478   :  { %8090 = vmatpush3.msra.mxu0 %v2291_v34  ;;  %8091 = vmatprep.mubr.f32.mxu0 %v2268_v2 }
 0x479   :  { %8094 = vmatprep.subr.mxu0 %v2203_v30  ;;  %v2861_v52 = vsub.f32 %v2859_v41, %v2860_v48 }
 0x47f   :  { %8092 = vmatmul.mubr.f32.vlgmr.msra.gmra.mrb[4].mxu0 %v2278_v44 }
 0x480   :  { %8095 = vmatpush3.msra.mxu0 %v2203_v30  ;;  %8096 = vmatprep.mubr.f32.mxu0 %v2268_v2 }
 0x487   :  { %8097 = vmatmul.mubr.f32.vlgmr.msra.gmra.mrb[4].mxu0 %v2278_v44 }
 0x55a   :  { %v8098_v55 = vpop.f32.mrb[4].mxu0 }
 0x55b   :  { %v8615_v56 = vadd.f32 %v8098_v55, %v7579_v53  ;;  %v2681_v59 = vpop.f32.mrb[5].mxu0 }
 0x55c   :  { %v8616_v63 = vadd.f32 %v7579_v53, %v2681_v59 }
 0x55d   :  { %v2698_v3 = vadd.f32 %v8615_v56, %v2694_v62  ;;  %v3800_v4 = vrot.slane %v8615_v56, 1  ;;  %v2862_v62 = vand.u32 4294901760, %v2861_v52  ;;  %v7590_v52 = vld [vmem:[%s9390_s7 + $0x30] sm:$0xff] }
 0x55e   :  { %v2697_v6 = vadd.f32 %v8616_v63, %v2692_v1  ;;  %v3799_v61 = vrot.slane %v8616_v63, 1  ;;  %v7584_v63 = vld [vmem:[%s9391_s8 + $0x1] ss:$0 sm:$0xff] }
 0x55f   :  { %2703 = vrot.lane.b32.xlu1 %v2698_v3, %s8838_s2 }
 0x560   :  { %2701 = vrot.lane.b32.xlu0 %v2697_v6, %s8838_s2  ;;  %v9106_v7 = vsel %vm1603_vm4, %v3800_v4, %v3799_v61  ;;  %v9110_v8 = vsel %vm1603_vm4, %v3799_v61, %v3800_v4 }
 0x5d1   :  { %v2704_v11 = vpop.permute.xlu1 %2703 }
 0x5d2   :  { %v2708_v14 = vrot.slane %v2704_v11, 7  ;;  %v2702_v15 = vpop.permute.xlu0 %2701 }
 0x5d3   :  { %v2707_v16 = vrot.slane %v2702_v15, 7 }
 0x5d5   :  { %v2710_v21 = vsel %vm2709_vm13, %v2707_v16, %v2708_v14  ;;  %v2711_v22 = vsel %vm2709_vm13, %v2708_v14, %v2707_v16  ;;  %v7587_v14 = vld [vmem:[%s9392_s9 + $0x8] sm:$0xff] }
 0x5d6   :  { %v2714_v25 = vsel %vm2712_vm14, %v2711_v22, 0.0  ;;  %v2717_v26 = vrot.slane %v2710_v21, 2  ;;  %v3311_v15 = vand.u32 4294901760, %v7587_v14 }
 0x5d7   :  { %v2716_v27 = vrot.slane %v2714_v25, 2 }
 0x5d8   :  { %8153 = vmatprep.subr.mxu0 %v3311_v15  ;;  %v3398_v58 = vsub.f32 %v7587_v14, %v3311_v15 }
 0x5d9   :  { %v9140_v30 = vsel %vm2718_vm15, %v2716_v27, %v2717_v26  ;;  %v2720_v31 = vsel %vm2718_vm15, %v2717_v26, %v2716_v27  ;;  %8154 = vmatpush3.msra.mxu0 %v3311_v15 }
 0x5da   :  { %2727 = vrot.lane.b32.xlu0 %v9140_v30, %s8835_s3  ;;  %v9148_v34 = vsel %vm2722_vm0, %v2720_v31, 0.0  ;;  %v3399_v18 = vand.u32 4294901760, %v3398_v58 }
 0x5db   :  { %2729 = vrot.lane.b32.xlu1 %v9148_v34, %s8835_s3 }
 0x5dc   :  { %v3400_v19 = vsub.f32 %v3398_v58, %v3399_v18 }
 0x64c   :  { %v2728_v38 = vpop.permute.xlu0 %2727 }
 0x64d   :  { %v2733_v39 = vsel %vm1091_vm6, %v2714_v25, %v2728_v38  ;;  %v2730_v40 = vpop.permute.xlu1 %2729 }
 0x64e   :  { %v2735_v42 = vsel %vm1629_vm11, %v2733_v39, %v9064_v57  ;;  %v2734_v43 = vsel %vm1091_vm6, %v2710_v21, %v2730_v40  ;;  %v7589_v39 = vld [vmem:[%s9393_s10 + $0x1] ss:$0 sm:$0xff] }
 0x64f   :  { %v2750_v44 = vsel %vm1642_vm12, %v2735_v42, 0  ;;  %v2736_v45 = vsel %vm1629_vm11, %v2734_v43, %v9072_v5 }
 0x650   :  { %v2823_v2 = vand.u32 4294901760, %v2750_v44  ;;  %v2753_v46 = vsel %vm1642_vm12, %v2736_v45, 0 }
 0x651   :  { %v2833_v47 = vand.u32 4294901760, %v2753_v46 }
 0x652   :  { %v2824_v0 = vsub.f32 %v2750_v44, %v2823_v2  ;;  %v3804_v44 = vsel %vm1608_vm5, %v9106_v7, 0.0 }
 0x653   :  { %v2834_v49 = vsub.f32 %v2753_v46, %v2833_v47 }
 0x654   :  { %v2825_v50 = vand.u32 4294901760, %v2824_v0 }
 0x655   :  { %v2835_v51 = vand.u32 4294901760, %v2834_v49 }
 0x656   :  { %v2826_v53 = vsub.f32 %v2824_v0, %v2825_v50 }
 0x657   :  { %v2836_v55 = vsub.f32 %v2834_v49, %v2835_v51 }
 0x658   :  { %v2827_v56 = vand.u32 4294901760, %v2826_v53  ;;  %v3860_v53 = vand.u32 4294901760, %v7590_v52 }
 0x659   :  { %v2837_v59 = vand.u32 4294901760, %v2836_v55 }
 0x65a   :  { %8105 = vmatprep.mubr.f32.mxu1 %v2827_v56  ;;  %v3949_v56 = vsub.f32 %v7590_v52, %v3860_v53 }
 0x65b   :  { %8106 = vmatmul.mubr.f32.vlgmr.msra.gmra.mrb[4].mxu1 %v2837_v59 }
 0x65c   :  { %8496 = vmatpush3.bf16.msra.mxu1 %v8493_v35  ;;  %8114 = vmatprep.mubr.f32.mxu1 %v2823_v2 }
 0x65d   :  { %8112 = vmatprep.subr.mxu1 %v2862_v62 }
 0x660   :  { %8113 = vmatpush3.msra.mxu1 %v2862_v62 }
 0x661   :  { %8498 = vmatprep.subr.bf16.mxu1 %v8497_v36 }
 0x663   :  { %8115 = vmatmul.mubr.f32.vlgmr.msra.gmra.mrb[4].mxu1 %v2833_v47 }
 0x664   :  { %8500 = vmatpush3.bf16.msra.mxu1 %v8497_v36  ;;  %8123 = vmatprep.mubr.f32.mxu1 %v2824_v0 }
 0x665   :  { %8121 = vmatprep.subr.mxu1 %v2859_v41 }
 0x668   :  { %8122 = vmatpush3.msra.mxu1 %v2859_v41 }
 0x669   :  { %8502 = vmatprep.subr.bf16.mxu1 %v9120_v17 }
 0x66b   :  { %8124 = vmatmul.mubr.f32.vlgmr.msra.gmra.mrb[4].mxu1 %v2834_v49 }
 0x66c   :  { %8504 = vmatpush3.bf16.msra.mxu1 %v9120_v17  ;;  %8132 = vmatprep.mubr.f32.mxu1 %v2825_v50 }
 0x66d   :  { %8130 = vmatprep.subr.mxu1 %v9125_v20 }
 0x670   :  { %8131 = vmatpush3.msra.mxu1 %v9125_v20 }
 0x671   :  { %8506 = vmatprep.subr.bf16.mxu1 %v8505_v37 }
 0x673   :  { %8133 = vmatmul.mubr.f32.vlgmr.msra.gmra.mrb[4].mxu1 %v2835_v51 }
 0x674   :  { %8508 = vmatpush3.bf16.msra.mxu1 %v8505_v37  ;;  %8141 = vmatprep.mubr.f32.mxu1 %v2823_v2 }
 0x675   :  { %8139 = vmatprep.subr.mxu1 %v2860_v48 }
 0x678   :  { %8140 = vmatpush3.msra.mxu1 %v2860_v48 }
 0x679   :  { %8510 = vmatprep.subr.bf16.mxu1 %v9120_v17 }
 0x67b   :  { %8142 = vmatmul.mubr.f32.vlgmr.msra.gmra.mrb[4].mxu1 %v2833_v47 }
 0x67c   :  { %8512 = vmatpush3.bf16.msra.mxu1 %v9120_v17  ;;  %8150 = vmatprep.mubr.f32.mxu1 %v2823_v2 }
 0x67d   :  { %8148 = vmatprep.subr.mxu1 %v9125_v20 }
 0x680   :  { %8149 = vmatpush3.msra.mxu1 %v9125_v20  ;;  %v3401_v20 = vand.u32 4294901760, %v3400_v19 }
 0x682   :  { %8158 = vmatprep.subr.mxu0 %v3401_v20 }
 0x683   :  { %8151 = vmatmul.mubr.f32.vlgmr.msra.gmra.mrb[4].mxu1 %v2833_v47 }
 0x756   :  { %v8152_v1 = vpop.f32.mrb[4].mxu1 }
 0x757   :  { %v8617_v3 = vadd.f32 %v8152_v1, %v7584_v63  ;;  %v3260_v4 = vpop.f32.mrb[5].mxu1 }
 0x758   :  { %v8618_v6 = vadd.f32 %v7584_v63, %v3260_v4  ;;  %v7592_v63 = vld [vmem:[%s9390_s7 + $0x40] sm:$0xff] }
 0x759   :  { %v7586_v61 = vmul.f32 -1.442695, %v8617_v3  ;;  %v9210_v1 = vand.u32 4294901760, %v7592_v63 }
 0x75a   :  { %v7585_v9 = vmul.f32 -1.442695, %v8618_v6 }
 0x75b   :  { %8799 = vpow2.f32 %v7586_v61  ;;  %v3950_v61 = vand.u32 4294901760, %v3949_v56 }
 0x75c   :  { %8801 = vpow2.f32 %v7585_v9 }
 0x765   :  { %v8800_v10 = vpop.eup %8799 }
 0x766   :  { %v8802_v11 = vpop.eup %8801  ;;  %v3279_v12 = vadd.f32 1.0, %v8800_v10 }
 0x767   :  { %v3278_v13 = vadd.f32 1.0, %v8802_v11 }
 0x768   :  { %8803 = vrcp.f32 %v3279_v12 }
 0x769   :  { %8805 = vrcp.f32 %v3278_v13  ;;  %v3951_v13 = vsub.f32 %v3949_v56, %v3950_v61 }
 0x76a   :  { %8807 = vtanh.f32 %v8617_v3  ;;  %v3963_v3 = vsub.f32 %v7592_v63, %v9210_v1 }
 0x76b   :  { %8809 = vtanh.f32 %v8618_v6 }
 0x772   :  { %v8804_v16 = vpop.eup %8803 }
 0x773   :  { %v8806_v17 = vpop.eup %8805  ;;  %3288 = vrot.lane.b32.xlu1 %v8804_v16, %s8837_s21 }
 0x774   :  { %3286 = vrot.lane.b32.xlu0 %v8806_v17, %s8837_s21  ;;  %v8808_v21 = vpop.eup %8807  ;;  %v3952_v17 = vand.u32 4294901760, %v3951_v13 }
 0x775   :  { %v8810_v23 = vpop.eup %8809 }
 0x777   :  { %3809 = vrot.lane.b32.xlu1 %v9148_v34, %s8836_s30 }
 0x778   :  { %3807 = vrot.lane.b32.xlu0 %v9140_v30, %s8836_s30 }
 0x7e5   :  { %v3289_v22 = vpop.permute.xlu1 %3288 }
 0x7e6   :  { %v3293_v24 = vmul.f32 %v8808_v21, %v3289_v22  ;;  %v3287_v25 = vpop.permute.xlu0 %3286 }
 0x7e7   :  { %v3292_v26 = vmul.f32 %v8810_v23, %v3287_v25 }
 0x7e8   :  { %v3308_v27 = vsel %vm1091_vm6, %v3293_v24, 0 }
 0x7e9   :  { %v3386_v28 = vand.u32 4294901760, %v3308_v27  ;;  %v3305_v29 = vsel %vm1091_vm6, %v3292_v26, 0  ;;  %v3810_v43 = vpop.permute.xlu1 %3809 }
 0x7ea   :  { %v3376_v31 = vand.u32 4294901760, %v3305_v29  ;;  %v3808_v2 = vpop.permute.xlu0 %3807 }
 0x7eb   :  { %v3387_v32 = vsub.f32 %v3308_v27, %v3386_v28 }
 0x7ec   :  { %v3377_v33 = vsub.f32 %v3305_v29, %v3376_v31 }
 0x7ed   :  { %v3388_v34 = vand.u32 4294901760, %v3387_v32 }
 0x7ee   :  { %v3378_v30 = vand.u32 4294901760, %v3377_v33 }
 0x7ef   :  { %v3389_v35 = vsub.f32 %v3387_v32, %v3388_v34 }
 0x7f0   :  { %v3379_v36 = vsub.f32 %v3377_v33, %v3378_v30 }
 0x7f1   :  { %v3390_v38 = vand.u32 4294901760, %v3389_v35 }
 0x7f2   :  { %v3380_v37 = vand.u32 4294901760, %v3379_v36 }
 0x7f4   :  { %8155 = vmatprep.mubr.f32.mxu0 %v3380_v37 }
 0x7f5   :  { %8156 = vmatmul.mubr.f32.vlgmr.msra.gmra.mrb[6].mxu0 %v3390_v38 }
 0x7f6   :  { %8159 = vmatpush3.msra.mxu0 %v3401_v20  ;;  %8160 = vmatprep.mubr.f32.mxu0 %v3376_v31 }
 0x7f7   :  { %8163 = vmatprep.subr.mxu0 %v3398_v58 }
 0x7fd   :  { %8161 = vmatmul.mubr.f32.vlgmr.msra.gmra.mrb[6].mxu0 %v3386_v28 }
 0x7fe   :  { %8164 = vmatpush3.msra.mxu0 %v3398_v58  ;;  %8165 = vmatprep.mubr.f32.mxu0 %v3377_v33 }
 0x7ff   :  { %8168 = vmatprep.subr.mxu0 %v3311_v15 }
 0x805   :  { %8166 = vmatmul.mubr.f32.vlgmr.msra.gmra.mrb[6].mxu0 %v3387_v32  ;;  %v3964_v32 = vand.u32 4294901760, %v3963_v3 }
 0x806   :  { %8169 = vmatpush3.msra.mxu0 %v3311_v15  ;;  %8170 = vmatprep.mubr.f32.mxu0 %v3378_v30 }
 0x807   :  { %8173 = vmatprep.subr.mxu0 %v3399_v18  ;;  %v3965_v36 = vsub.f32 %v3963_v3, %v3964_v32 }
 0x80d   :  { %8171 = vmatmul.mubr.f32.vlgmr.msra.gmra.mrb[6].mxu0 %v3388_v34 }
 0x80e   :  { %8174 = vmatpush3.msra.mxu0 %v3399_v18  ;;  %8175 = vmatprep.mubr.f32.mxu0 %v3376_v31 }
 0x80f   :  { %8178 = vmatprep.subr.mxu0 %v3311_v15 }
 0x815   :  { %8176 = vmatmul.mubr.f32.vlgmr.msra.gmra.mrb[6].mxu0 %v3386_v28 }
 0x816   :  { %8179 = vmatpush3.msra.mxu0 %v3311_v15  ;;  %8180 = vmatprep.mubr.f32.mxu0 %v3376_v31 }
 0x81d   :  { %8181 = vmatmul.mubr.f32.vlgmr.msra.gmra.mrb[6].mxu0 %v3386_v28 }
 0x8f0   :  { %v8182_v40 = vpop.f32.mrb[6].mxu0 }
 0x8f1   :  { %v8619_v41 = vadd.f32 %v8182_v40, %v7589_v39  ;;  %v3789_v42 = vpop.f32.mrb[7].mxu0 }
 0x8f2   :  { %v8620_v45 = vadd.f32 %v7589_v39, %v3789_v42 }
 0x8f3   :  { %v3806_v46 = vadd.f32 %v8619_v41, %v3804_v44  ;;  %v3814_v47 = vadd.f32 %v8619_v41, %v3810_v43  ;;  %v3966_v41 = vand.u32 4294901760, %v3965_v36  ;;  %v7594_v44 = vld [vmem:[%s9391_s8 + $0x2] ss:$0 sm:$0xff] }
 0x8f4   :  { %v3805_v48 = vadd.f32 %v8620_v45, %v9110_v8  ;;  %v3813_v0 = vadd.f32 %v8620_v45, %v3808_v2  ;;  %v7591_v8 = vld [vmem:[%s9390_s7 + $0x38] sm:$0xff] }
 0x8f5   :  { %v4904_v49 = vrot.slane %v3806_v46, 1  ;;  %3819 = vrot.lane.b32.xlu1 %v3814_v47, %s8838_s2  ;;  %v3863_v55 = vand.u32 4294901760, %v7591_v8 }
 0x8f6   :  { %v4903_v50 = vrot.slane %v3805_v48, 1  ;;  %3817 = vrot.lane.b32.xlu0 %v3813_v0, %s8838_s2 }
 0x8f7   :  { %v3956_v59 = vsub.f32 %v7591_v8, %v3863_v55  ;;  %v9213_v4 = vpack.c.bf16 %v3863_v55, %v3860_v53 }
 0x8f8   :  { %v9195_v51 = vsel %vm1603_vm4, %v4904_v49, %v4903_v50  ;;  %v9199_v7 = vsel %vm1603_vm4, %v4903_v50, %v4904_v49 }
 0x8f9   :  { %v8521_v62 = vpack.c.bf16 %v3956_v59, %v3949_v56  ;;  %8514 = vmatprep.subr.bf16.mxu1 %v9213_v4  ;;  %v3957_v9 = vand.u32 4294901760, %v3956_v59  ;;  %v7597_v56 = vld [vmem:[%s9392_s9 + $0x10] sm:$0xff] }
 0x8fa   :  { %8516 = vmatpush3.bf16.msra.mxu1 %v9213_v4 }
 0x8fb   :  { %8522 = vmatprep.subr.bf16.mxu0 %v8521_v62  ;;  %8187 = vmatprep.subr.mxu1 %v9210_v1  ;;  %v3958_v14 = vsub.f32 %v3956_v59, %v3957_v9  ;;  %v8529_v20 = vpack.c.bf16 %v3957_v9, %v3950_v61  ;;  %v4415_v59 = vand.u32 4294901760, %v7597_v56 }
 0x8fc   :  { %8524 = vmatpush3.bf16.msra.mxu0 %v8521_v62 }
 0x8fd   :  { %8205 = vmatprep.subr.mxu0 %v3963_v3  ;;  %v3959_v58 = vand.u32 4294901760, %v3958_v14 }
 0x8fe   :  { %8188 = vmatpush3.msra.mxu1 %v9210_v1 }
 0x8ff   :  { %v8517_v19 = vpack.c.bf16 %v3959_v58, %v3952_v17 }
 0x900   :  { %8206 = vmatpush3.msra.mxu0 %v3963_v3 }
 0x901   :  { %8526 = vmatprep.subr.bf16.mxu0 %v9213_v4  ;;  %8518 = vmatprep.subr.bf16.mxu1 %v8517_v19 }
 0x967   :  { %v3820_v6 = vpop.permute.xlu1 %3819 }
 0x968   :  { %v3824_v10 = vrot.slane %v3820_v6, 1  ;;  %v3818_v11 = vpop.permute.xlu0 %3817 }
 0x969   :  { %v3823_v12 = vrot.slane %v3818_v11, 1 }
 0x96b   :  { %v9221_v15 = vsel %vm1603_vm4, %v3823_v12, %v3824_v10  ;;  %v3826_v16 = vsel %vm1603_vm4, %v3824_v10, %v3823_v12 }
 0x96c   :  { %3831 = vrot.lane.b32.xlu0 %v9221_v15, %s8835_s3  ;;  %v9229_v18 = vsel %vm1608_vm5, %v3826_v16, 0.0 }
 0x96d   :  { %3833 = vrot.lane.b32.xlu1 %v9229_v18, %s8835_s3 }
 0x9de   :  { %v3832_v21 = vpop.permute.xlu0 %3831 }
 0x9df   :  { %v3837_v22 = vsel %vm1091_vm6, %v3818_v11, %v3832_v21  ;;  %v3834_v23 = vpop.permute.xlu1 %3833 }
 0x9e0   :  { %v3839_v24 = vsel %vm1629_vm11, %v3837_v22, %v9064_v57  ;;  %v3838_v25 = vsel %vm1091_vm6, %v3820_v6, %v3834_v23 }
 0x9e1   :  { %v3840_v26 = vsel %vm1629_vm11, %v3838_v25, %v9072_v5  ;;  %v3854_v27 = vsel %vm1642_vm12, %v3839_v24, 0  ;;  %v7599_v25 = vld [vmem:[%s9393_s10 + $0x2] ss:$0 sm:$0xff] }
 0x9e2   :  { %v3857_v28 = vsel %vm1642_vm12, %v3840_v26, 0  ;;  %v3927_v29 = vand.u32 4294901760, %v3854_v27 }
 0x9e3   :  { %v3937_v31 = vand.u32 4294901760, %v3857_v28 }
 0x9e4   :  { %v3928_v33 = vsub.f32 %v3854_v27, %v3927_v29 }
 0x9e5   :  { %v3938_v34 = vsub.f32 %v3857_v28, %v3937_v31 }
 0x9e6   :  { %8207 = vmatprep.mubr.f32.mxu0 %v3928_v33  ;;  %v3929_v30 = vand.u32 4294901760, %v3928_v33 }
 0x9e7   :  { %8208 = vmatmul.mubr.f32.vlgmr.msra.gmra.mrb[8].mxu0 %v3938_v34  ;;  %v3939_v35 = vand.u32 4294901760, %v3938_v34 }
 0x9e8   :  { %8528 = vmatpush3.bf16.msra.mxu0 %v9213_v4  ;;  %8216 = vmatprep.mubr.f32.mxu0 %v3929_v30  ;;  %v3930_v37 = vsub.f32 %v3928_v33, %v3929_v30 }
 0x9e9   :  { %8214 = vmatprep.subr.mxu0 %v9210_v1  ;;  %v3940_v38 = vsub.f32 %v3938_v34, %v3939_v35 }
 0x9ea   :  { %v3931_v39 = vand.u32 4294901760, %v3930_v37 }
 0x9eb   :  { %v3941_v40 = vand.u32 4294901760, %v3940_v38 }
 0x9ec   :  { %8215 = vmatpush3.msra.mxu0 %v9210_v1  ;;  %8189 = vmatprep.mubr.f32.mxu1 %v3931_v39 }
 0x9ed   :  { %8190 = vmatmul.mubr.f32.vlgmr.msra.gmra.mrb[6].mxu1 %v3941_v40  ;;  %8530 = vmatprep.subr.bf16.mxu0 %v8529_v20  ;;  %v7600_v40 = vld [vmem:[%s9390_s7 + $0x48] sm:$0xff] }
 0x9ee   :  { %8198 = vmatprep.mubr.f32.mxu1 %v3927_v29  ;;  %8520 = vmatpush3.bf16.msra.mxu1 %v8517_v19 }
 0x9ef   :  { %8217 = vmatmul.mubr.f32.vlgmr.msra.gmra.mrb[8].mxu0 %v3939_v35  ;;  %8196 = vmatprep.subr.mxu1 %v3966_v41 }
 0x9f0   :  { %8532 = vmatpush3.bf16.msra.mxu0 %v8529_v20  ;;  %8225 = vmatprep.mubr.f32.mxu0 %v3927_v29 }
 0x9f1   :  { %8223 = vmatprep.subr.mxu0 %v3964_v32 }
 0x9f2   :  { %8197 = vmatpush3.msra.mxu1 %v3966_v41 }
 0x9f3   :  { %8237 = vmatprep.subr.mxu1 %v4415_v59 }
 0x9f4   :  { %8224 = vmatpush3.msra.mxu0 %v3964_v32 }
 0x9f5   :  { %8199 = vmatmul.mubr.f32.vlgmr.msra.gmra.mrb[6].mxu1 %v3937_v31  ;;  %8534 = vmatprep.subr.bf16.mxu0 %v9213_v4 }
 0x9f6   :  { %8238 = vmatpush3.msra.mxu1 %v4415_v59 }
 0x9f7   :  { %8226 = vmatmul.mubr.f32.vlgmr.msra.gmra.mrb[8].mxu0 %v3937_v31 }
 0x9f8   :  { %8536 = vmatpush3.bf16.msra.mxu0 %v9213_v4  ;;  %8234 = vmatprep.mubr.f32.mxu0 %v3927_v29 }
 0x9f9   :  { %8232 = vmatprep.subr.mxu0 %v9210_v1 }
 0x9fc   :  { %8233 = vmatpush3.msra.mxu0 %v9210_v1  ;;  %v4502_v1 = vsub.f32 %v7597_v56, %v4415_v59 }
 0x9fe   :  { %v4503_v3 = vand.u32 4294901760, %v4502_v1 }
 0x9ff   :  { %8235 = vmatmul.mubr.f32.vlgmr.msra.gmra.mrb[8].mxu0 %v3937_v31  ;;  %v4908_v31 = vsel %vm1608_vm5, %v9195_v51, 0.0 }
 0xa00   :  { %v4504_v4 = vsub.f32 %v4502_v1, %v4503_v3 }
 0xa02   :  { %v4505_v6 = vand.u32 4294901760, %v4504_v4 }
 0xa04   :  { %8242 = vmatprep.subr.mxu1 %v4505_v6 }
 0xac8   :  { %v8200_v42 = vpop.f32.mrb[6].mxu1 }
 0xac9   :  { %v4029_v43 = vpop.f32.mrb[7].mxu1  ;;  %v8621_v45 = vadd.f32 %v8200_v42, %v7594_v44  ;;  %v4970_v42 = vand.u32 4294901760, %v7600_v40 }
 0xaca   :  { %v8623_v2 = vadd.f32 %v7594_v44, %v4029_v43 }
 0xad2   :  { %v8236_v46 = vpop.f32.mrb[8].mxu0 }
 0xad3   :  { %v8622_v47 = vadd.f32 %v8621_v45, %v8236_v46  ;;  %v4364_v48 = vpop.f32.mrb[9].mxu0 }
 0xad4   :  { %v8624_v0 = vadd.f32 %v8623_v2, %v4364_v48  ;;  %v5059_v48 = vsub.f32 %v7600_v40, %v4970_v42 }
 0xad5   :  { %v7596_v49 = vmul.f32 -1.442695, %v8622_v47 }
 0xad6   :  { %v7595_v50 = vmul.f32 -1.442695, %v8624_v0 }
 0xad7   :  { %8811 = vpow2.f32 %v7596_v49 }
 0xad8   :  { %8813 = vpow2.f32 %v7595_v50 }
 0xae1   :  { %v8812_v52 = vpop.eup %8811 }
 0xae2   :  { %v8814_v8 = vpop.eup %8813  ;;  %v4383_v53 = vadd.f32 1.0, %v8812_v52 }
 0xae3   :  { %v4382_v55 = vadd.f32 1.0, %v8814_v8  ;;  %v5060_v8 = vand.u32 4294901760, %v5059_v48 }
 0xae4   :  { %8815 = vrcp.f32 %v4383_v53 }
 0xae5   :  { %8817 = vrcp.f32 %v4382_v55 }
 0xae6   :  { %8819 = vtanh.f32 %v8622_v47  ;;  %v7602_v47 = vld [vmem:[%s9390_s7 + $0x58] sm:$0xff] }
 0xae7   :  { %8821 = vtanh.f32 %v8624_v0  ;;  %v9291_v49 = vand.u32 4294901760, %v7602_v47 }
 0xaee   :  { %v8816_v62 = vpop.eup %8815 }
 0xaef   :  { %v8818_v63 = vpop.eup %8817  ;;  %4392 = vrot.lane.b32.xlu1 %v8816_v62, %s8837_s21  ;;  %v5061_v62 = vsub.f32 %v5059_v48, %v5060_v8 }
 0xaf0   :  { %4390 = vrot.lane.b32.xlu0 %v8818_v63, %s8837_s21  ;;  %v8820_v61 = vpop.eup %8819 }
 0xaf1   :  { %v8822_v10 = vpop.eup %8821  ;;  %v5062_v4 = vand.u32 4294901760, %v5061_v62 }
 0xaf3   :  { %4913 = vrot.lane.b32.xlu1 %v9229_v18, %s8836_s30 }
 0xaf4   :  { %4911 = vrot.lane.b32.xlu0 %v9221_v15, %s8836_s30 }
 0xb61   :  { %v4393_v9 = vpop.permute.xlu1 %4392 }
 0xb62   :  { %v4397_v11 = vmul.f32 %v8820_v61, %v4393_v9  ;;  %v4391_v12 = vpop.permute.xlu0 %4390 }
 0xb63   :  { %v4396_v13 = vmul.f32 %v8822_v10, %v4391_v12 }
 0xb64   :  { %v4412_v14 = vsel %vm1091_vm6, %v4397_v11, 0 }
 0xb65   :  { %v4490_v16 = vand.u32 4294901760, %v4412_v14  ;;  %v4409_v17 = vsel %vm1091_vm6, %v4396_v13, 0  ;;  %v4914_v29 = vpop.permute.xlu1 %4913 }
 0xb66   :  { %v4480_v58 = vand.u32 4294901760, %v4409_v17  ;;  %v4912_v33 = vpop.permute.xlu0 %4911 }
 0xb67   :  { %v4491_v18 = vsub.f32 %v4412_v14, %v4490_v16  ;;  %v5073_v14 = vsub.f32 %v7602_v47, %v9291_v49 }
 0xb68   :  { %v4481_v19 = vsub.f32 %v4409_v17, %v4480_v58 }
 0xb69   :  { %v4492_v20 = vand.u32 4294901760, %v4491_v18 }
 0xb6a   :  { %v4482_v15 = vand.u32 4294901760, %v4481_v19 }
 0xb6b   :  { %v4493_v21 = vsub.f32 %v4491_v18, %v4492_v20 }
 0xb6c   :  { %v4483_v22 = vsub.f32 %v4481_v19, %v4482_v15 }
 0xb6d   :  { %v4494_v24 = vand.u32 4294901760, %v4493_v21  ;;  %v5074_v21 = vand.u32 4294901760, %v5073_v14 }
 0xb6e   :  { %v4484_v23 = vand.u32 4294901760, %v4483_v22 }
 0xb70   :  { %8239 = vmatprep.mubr.f32.mxu1 %v4484_v23 }
 0xb71   :  { %8240 = vmatmul.mubr.f32.vlgmr.msra.gmra.mrb[8].mxu1 %v4494_v24 }
 0xb72   :  { %8243 = vmatpush3.msra.mxu1 %v4505_v6  ;;  %8244 = vmatprep.mubr.f32.mxu1 %v4480_v58 }
 0xb73   :  { %8247 = vmatprep.subr.mxu1 %v4502_v1 }
 0xb79   :  { %8245 = vmatmul.mubr.f32.vlgmr.msra.gmra.mrb[8].mxu1 %v4490_v16 }
 0xb7a   :  { %8248 = vmatpush3.msra.mxu1 %v4502_v1  ;;  %8249 = vmatprep.mubr.f32.mxu1 %v4481_v19 }
 0xb7b   :  { %8252 = vmatprep.subr.mxu1 %v4415_v59 }
 0xb81   :  { %8250 = vmatmul.mubr.f32.vlgmr.msra.gmra.mrb[8].mxu1 %v4491_v18 }
 0xb82   :  { %8253 = vmatpush3.msra.mxu1 %v4415_v59  ;;  %8254 = vmatprep.mubr.f32.mxu1 %v4482_v15 }
 0xb83   :  { %8257 = vmatprep.subr.mxu1 %v4503_v3 }
 0xb89   :  { %8255 = vmatmul.mubr.f32.vlgmr.msra.gmra.mrb[8].mxu1 %v4492_v20 }
 0xb8a   :  { %8258 = vmatpush3.msra.mxu1 %v4503_v3  ;;  %8259 = vmatprep.mubr.f32.mxu1 %v4480_v58 }
 0xb8b   :  { %8262 = vmatprep.subr.mxu1 %v4415_v59 }
 0xb91   :  { %8260 = vmatmul.mubr.f32.vlgmr.msra.gmra.mrb[8].mxu1 %v4490_v16 }
 0xb92   :  { %8263 = vmatpush3.msra.mxu1 %v4415_v59  ;;  %8264 = vmatprep.mubr.f32.mxu1 %v4480_v58 }
 0xb99   :  { %8265 = vmatmul.mubr.f32.vlgmr.msra.gmra.mrb[8].mxu1 %v4490_v16 }
 0xc6c   :  { %v8266_v26 = vpop.f32.mrb[8].mxu1 }
 0xc6d   :  { %v8625_v27 = vadd.f32 %v8266_v26, %v7599_v25  ;;  %v4893_v28 = vpop.f32.mrb[9].mxu1  ;;  %v5075_v26 = vsub.f32 %v5073_v14, %v5074_v21 }
 0xc6e   :  { %v8626_v32 = vadd.f32 %v7599_v25, %v4893_v28 }
 0xc6f   :  { %v4910_v34 = vadd.f32 %v8625_v27, %v4908_v31  ;;  %v4918_v30 = vadd.f32 %v8625_v27, %v4914_v29  ;;  %v5076_v31 = vand.u32 4294901760, %v5075_v26 }
 0xc70   :  { %v4909_v35 = vadd.f32 %v8626_v32, %v9199_v7  ;;  %v4917_v36 = vadd.f32 %v8626_v32, %v4912_v33  ;;  %v7601_v7 = vld [vmem:[%s9390_s7 + $0x50] sm:$0xff] }
 0xc71   :  { %v6014_v37 = vrot.slane %v4910_v34, 1  ;;  %4923 = vrot.lane.b32.xlu1 %v4918_v30, %s8838_s2  ;;  %v4973_v43 = vand.u32 4294901760, %v7601_v7 }
 0xc72   :  { %v6013_v38 = vrot.slane %v4909_v35, 1  ;;  %4921 = vrot.lane.b32.xlu0 %v4917_v36, %s8838_s2 }
 0xc73   :  { %v9286_v46 = vpack.c.bf16 %v4973_v43, %v4970_v42  ;;  %v5066_v0 = vsub.f32 %v7601_v7, %v4973_v43 }
 0xc74   :  { %v9274_v39 = vsel %vm1603_vm4, %v6014_v37, %v6013_v38  ;;  %v9278_v51 = vsel %vm1603_vm4, %v6013_v38, %v6014_v37 }
 0xc75   :  { %8538 = vmatprep.subr.bf16.mxu1 %v9286_v46  ;;  %v5067_v53 = vand.u32 4294901760, %v5066_v0  ;;  %v8545_v10 = vpack.c.bf16 %v5066_v0, %v5059_v48 }
 0xc76   :  { %8540 = vmatpush3.bf16.msra.mxu1 %v9286_v46 }
 0xc77   :  { %8271 = vmatprep.subr.mxu1 %v9291_v49  ;;  %v5068_v63 = vsub.f32 %v5066_v0, %v5067_v53  ;;  %v8553_v11 = vpack.c.bf16 %v5067_v53, %v5060_v8 }
 0xc79   :  { %v5069_v6 = vand.u32 4294901760, %v5068_v63 }
 0xc7a   :  { %8272 = vmatpush3.msra.mxu1 %v9291_v49 }
 0xc7b   :  { %v8541_v9 = vpack.c.bf16 %v5069_v6, %v5062_v4 }
 0xc7d   :  { %8542 = vmatprep.subr.bf16.mxu1 %v8541_v9 }
 0xce3   :  { %v4924_v41 = vpop.permute.xlu1 %4923 }
 0xce4   :  { %v4928_v44 = vrot.slane %v4924_v41, 7  ;;  %v4922_v45 = vpop.permute.xlu0 %4921  ;;  %v7607_v41 = vld [vmem:[%s9392_s9 + $0x18] sm:$0xff] }
 0xce5   :  { %v4927_v2 = vrot.slane %v4922_v45, 7  ;;  %v5525_v42 = vand.u32 4294901760, %v7607_v41 }
 0xce7   :  { %v4929_v50 = vsel %vm2709_vm13, %v4927_v2, %v4928_v44  ;;  %v4930_v52 = vsel %vm2709_vm13, %v4928_v44, %v4927_v2  ;;  %8321 = vmatprep.subr.mxu0 %v5525_v42  ;;  %v5612_v45 = vsub.f32 %v7607_v41, %v5525_v42 }
 0xce8   :  { %v4931_v55 = vsel %vm2712_vm14, %v4930_v52, 0.0  ;;  %v4934_v56 = vrot.slane %v4929_v50, 2  ;;  %8322 = vmatpush3.msra.mxu0 %v5525_v42 }
 0xce9   :  { %v4933_v59 = vrot.slane %v4931_v55, 2  ;;  %v5613_v2 = vand.u32 4294901760, %v5612_v45 }
 0xceb   :  { %v4935_v1 = vsel %vm2718_vm15, %v4933_v59, %v4934_v56  ;;  %v4936_v3 = vsel %vm2718_vm15, %v4934_v56, %v4933_v59 }
 0xcec   :  { %4941 = vrot.lane.b32.xlu0 %v4935_v1, %s8835_s3  ;;  %v4938_v61 = vsel %vm2722_vm0, %v4936_v3, 0.0 }
 0xced   :  { %4943 = vrot.lane.b32.xlu1 %v4938_v61, %s8835_s3 }
 0xd5e   :  { %v4942_v12 = vpop.permute.xlu0 %4941 }
 0xd5f   :  { %v4947_v13 = vsel %vm1091_vm6, %v4931_v55, %v4942_v12  ;;  %v4944_v54 = vpop.permute.xlu1 %4943 }
 0xd60   :  { %v4949_v16 = vsel %vm1629_vm11, %v4947_v13, %v9064_v57  ;;  %v4948_v17 = vsel %vm1091_vm6, %v4929_v50, %v4944_v54 }
 0xd61   :  { %v4964_v58 = vsel %vm1642_vm12, %v4949_v16, 0  ;;  %v4950_v18 = vsel %vm1629_vm11, %v4948_v17, %v9072_v5  ;;  %v7604_v5 = vld [vmem:[%s9391_s8 + $0x3] ss:$0 sm:$0xff] }
 0xd62   :  { %v5037_v19 = vand.u32 4294901760, %v4964_v58  ;;  %v4967_v20 = vsel %vm1642_vm12, %v4950_v18, 0 }
 0xd63   :  { %v5047_v15 = vand.u32 4294901760, %v4967_v20 }
 0xd64   :  { %v5038_v22 = vsub.f32 %v4964_v58, %v5037_v19 }
 0xd65   :  { %v5048_v23 = vsub.f32 %v4967_v20, %v5047_v15 }
 0xd66   :  { %v5039_v24 = vand.u32 4294901760, %v5038_v22 }
 0xd67   :  { %v5049_v25 = vand.u32 4294901760, %v5048_v23 }
 0xd68   :  { %v5040_v27 = vsub.f32 %v5038_v22, %v5039_v24 }
 0xd69   :  { %v5050_v28 = vsub.f32 %v5048_v23, %v5049_v25 }
 0xd6a   :  { %v5041_v57 = vand.u32 4294901760, %v5040_v27 }
 0xd6b   :  { %v5051_v29 = vand.u32 4294901760, %v5050_v28  ;;  %v6018_v28 = vsel %vm1608_vm5, %v9274_v39, 0.0 }
 0xd6c   :  { %8273 = vmatprep.mubr.f32.mxu1 %v5041_v57 }
 0xd6d   :  { %8274 = vmatmul.mubr.f32.vlgmr.msra.gmra.mrb[10].mxu1 %v5051_v29 }
 0xd6e   :  { %8544 = vmatpush3.bf16.msra.mxu1 %v8541_v9  ;;  %8282 = vmatprep.mubr.f32.mxu1 %v5037_v19 }
 0xd6f   :  { %8280 = vmatprep.subr.mxu1 %v5076_v31 }
 0xd72   :  { %8281 = vmatpush3.msra.mxu1 %v5076_v31 }
 0xd73   :  { %8546 = vmatprep.subr.bf16.mxu1 %v8545_v10 }
 0xd75   :  { %8283 = vmatmul.mubr.f32.vlgmr.msra.gmra.mrb[10].mxu1 %v5047_v15 }
 0xd76   :  { %8548 = vmatpush3.bf16.msra.mxu1 %v8545_v10  ;;  %8291 = vmatprep.mubr.f32.mxu1 %v5038_v22  ;;  %v6023_v10 = vld [vmem:[%s9394_s11] sm:$0xff] }
 0xd77   :  { %8289 = vmatprep.subr.mxu1 %v5073_v14  ;;  %v6039_v12 = vand.u32 4294901760, %v6023_v10 }
 0xd7a   :  { %8290 = vmatpush3.msra.mxu1 %v5073_v14  ;;  %v6127_v14 = vsub.f32 %v6023_v10, %v6039_v12 }
 0xd7b   :  { %8550 = vmatprep.subr.bf16.mxu1 %v9286_v46 }
 0xd7c   :  { %v6128_v17 = vand.u32 4294901760, %v6127_v14 }
 0xd7d   :  { %8292 = vmatmul.mubr.f32.vlgmr.msra.gmra.mrb[10].mxu1 %v5048_v23 }
 0xd7e   :  { %8552 = vmatpush3.bf16.msra.mxu1 %v9286_v46  ;;  %8300 = vmatprep.mubr.f32.mxu1 %v5039_v24  ;;  %v6129_v18 = vsub.f32 %v6127_v14, %v6128_v17  ;;  %v7609_v24 = vld [vmem:[%s9393_s10 + $0x3] ss:$0 sm:$0xff] }
 0xd7f   :  { %8298 = vmatprep.subr.mxu1 %v9291_v49 }
 0xd80   :  { %v6130_v20 = vand.u32 4294901760, %v6129_v18  ;;  %v7061_v18 = vld [vmem:[%s9397_s15] sm:$0xff] }
 0xd82   :  { %8299 = vmatpush3.msra.mxu1 %v9291_v49 }
 0xd83   :  { %8554 = vmatprep.subr.bf16.mxu1 %v8553_v11 }
 0xd85   :  { %8301 = vmatmul.mubr.f32.vlgmr.msra.gmra.mrb[10].mxu1 %v5049_v25 }
 0xd86   :  { %8556 = vmatpush3.bf16.msra.mxu1 %v8553_v11  ;;  %8309 = vmatprep.mubr.f32.mxu1 %v5037_v19  ;;  %v6024_v11 = vld [vmem:[%s9394_s11 + $0x8] sm:$0xff] }
 0xd87   :  { %8307 = vmatprep.subr.mxu1 %v5074_v21  ;;  %v6042_v13 = vand.u32 4294901760, %v6024_v11 }
 0xd89   :  { %v8561_v54 = vpack.c.bf16 %v6042_v13, %v6039_v12  ;;  %v6134_v16 = vsub.f32 %v6024_v11, %v6042_v13 }
 0xd8a   :  { %8308 = vmatpush3.msra.mxu1 %v5074_v21 }
 0xd8b   :  { %8558 = vmatprep.subr.bf16.mxu1 %v9286_v46  ;;  %v6135_v58 = vand.u32 4294901760, %v6134_v16  ;;  %v8569_v21 = vpack.c.bf16 %v6134_v16, %v6127_v14 }
 0xd8d   :  { %8310 = vmatmul.mubr.f32.vlgmr.msra.gmra.mrb[10].mxu1 %v5047_v15  ;;  %v8577_v23 = vpack.c.bf16 %v6135_v58, %v6128_v17 }
 0xd8e   :  { %8560 = vmatpush3.bf16.msra.mxu1 %v9286_v46  ;;  %8318 = vmatprep.mubr.f32.mxu1 %v5037_v19  ;;  %v5614_v46 = vsub.f32 %v5612_v45, %v5613_v2  ;;  %v6136_v19 = vsub.f32 %v6134_v16, %v6135_v58 }
 0xd8f   :  { %8316 = vmatprep.subr.mxu1 %v9291_v49 }
 0xd90   :  { %v5615_v47 = vand.u32 4294901760, %v5614_v46 }
 0xd92   :  { %8317 = vmatpush3.msra.mxu1 %v9291_v49  ;;  %8326 = vmatprep.subr.mxu0 %v5615_v47 }
 0xd95   :  { %8319 = vmatmul.mubr.f32.vlgmr.msra.gmra.mrb[10].mxu1 %v5047_v15  ;;  %v6137_v15 = vand.u32 4294901760, %v6136_v19  ;;  %v7076_v19 = vand.u32 4294901760, %v7061_v18 }
 0xd97   :  { %v8565_v22 = vpack.c.bf16 %v6137_v15, %v6130_v20  ;;  %v7163_v20 = vsub.f32 %v7061_v18, %v7076_v19 }
 0xd99   :  { %v7164_v15 = vand.u32 4294901760, %v7163_v20 }
 0xe68   :  { %v8320_v32 = vpop.f32.mrb[10].mxu1 }
 0xe69   :  { %v8627_v33 = vadd.f32 %v8320_v32, %v7604_v5  ;;  %v5474_v34 = vpop.f32.mrb[11].mxu1 }
 0xe6a   :  { %v8628_v30 = vadd.f32 %v7604_v5, %v5474_v34 }
 0xe6b   :  { %v7606_v35 = vmul.f32 -1.442695, %v8627_v33 }
 0xe6c   :  { %v7605_v36 = vmul.f32 -1.442695, %v8628_v30 }
 0xe6d   :  { %8823 = vpow2.f32 %v7606_v35 }
 0xe6e   :  { %8825 = vpow2.f32 %v7605_v36 }
 0xe77   :  { %v8824_v37 = vpop.eup %8823 }
 0xe78   :  { %v8826_v38 = vpop.eup %8825  ;;  %v5493_v40 = vadd.f32 1.0, %v8824_v37 }
 0xe79   :  { %v5492_v7 = vadd.f32 1.0, %v8826_v38 }
 0xe7a   :  { %8827 = vrcp.f32 %v5493_v40 }
 0xe7b   :  { %8829 = vrcp.f32 %v5492_v7 }
 0xe7c   :  { %8831 = vtanh.f32 %v8627_v33 }
 0xe7d   :  { %8833 = vtanh.f32 %v8628_v30 }
 0xe84   :  { %v8828_v43 = vpop.eup %8827 }
 0xe85   :  { %v8830_v44 = vpop.eup %8829  ;;  %5502 = vrot.lane.b32.xlu1 %v8828_v43, %s8837_s21 }
 0xe86   :  { %5500 = vrot.lane.b32.xlu0 %v8830_v44, %s8837_s21  ;;  %v8832_v48 = vpop.eup %8831 }
 0xe87   :  { %v8834_v49 = vpop.eup %8833 }
 0xef7   :  { %v5503_v0 = vpop.permute.xlu1 %5502 }
 0xef8   :  { %v5507_v50 = vmul.f32 %v8832_v48, %v5503_v0  ;;  %v5501_v52 = vpop.permute.xlu0 %5500 }
 0xef9   :  { %v5506_v8 = vmul.f32 %v8834_v49, %v5501_v52 }
 0xefa   :  { %v5522_v53 = vsel %vm1091_vm6, %v5507_v50, 0 }
 0xefb   :  { %v5600_v55 = vand.u32 4294901760, %v5522_v53  ;;  %v5519_v56 = vsel %vm1091_vm6, %v5506_v8, 0 }
 0xefc   :  { %v5590_v59 = vand.u32 4294901760, %v5519_v56 }
 0xefd   :  { %v5601_v62 = vsub.f32 %v5522_v53, %v5600_v55 }
 0xefe   :  { %v5591_v63 = vsub.f32 %v5519_v56, %v5590_v59  ;;  %v7610_v56 = vld [vmem:[%s9396_s12] ss:$0 sm:$0xff] }
 0xeff   :  { %v5602_v1 = vand.u32 4294901760, %v5601_v62 }
 0xf00   :  { %v5592_v3 = vand.u32 4294901760, %v5591_v63 }
 0xf01   :  { %v5603_v4 = vsub.f32 %v5601_v62, %v5602_v1 }
 0xf02   :  { %v5593_v6 = vsub.f32 %v5591_v63, %v5592_v3 }
 0xf03   :  { %v5604_v9 = vand.u32 4294901760, %v5603_v4 }
 0xf04   :  { %v5594_v61 = vand.u32 4294901760, %v5593_v6 }
 0xf06   :  { %8323 = vmatprep.mubr.f32.mxu0 %v5594_v61 }
 0xf07   :  { %8324 = vmatmul.mubr.f32.vlgmr.msra.gmra.mrb[10].mxu0 %v5604_v9 }
 0xf08   :  { %8327 = vmatpush3.msra.mxu0 %v5615_v47  ;;  %8328 = vmatprep.mubr.f32.mxu0 %v5590_v59 }
 0xf09   :  { %8331 = vmatprep.subr.mxu0 %v5612_v45 }
 0xf0f   :  { %8329 = vmatmul.mubr.f32.vlgmr.msra.gmra.mrb[10].mxu0 %v5600_v55 }
 0xf10   :  { %8332 = vmatpush3.msra.mxu0 %v5612_v45  ;;  %8333 = vmatprep.mubr.f32.mxu0 %v5591_v63 }
 0xf11   :  { %8336 = vmatprep.subr.mxu0 %v5525_v42 }
 0xf17   :  { %8334 = vmatmul.mubr.f32.vlgmr.msra.gmra.mrb[10].mxu0 %v5601_v62 }
 0xf18   :  { %8337 = vmatpush3.msra.mxu0 %v5525_v42  ;;  %8338 = vmatprep.mubr.f32.mxu0 %v5592_v3 }
 0xf19   :  { %8341 = vmatprep.subr.mxu0 %v5613_v2 }
 0xf1f   :  { %8339 = vmatmul.mubr.f32.vlgmr.msra.gmra.mrb[10].mxu0 %v5602_v1 }
 0xf20   :  { %8342 = vmatpush3.msra.mxu0 %v5613_v2  ;;  %8343 = vmatprep.mubr.f32.mxu0 %v5590_v59 }
 0xf21   :  { %8346 = vmatprep.subr.mxu0 %v5525_v42 }
 0xf27   :  { %8344 = vmatmul.mubr.f32.vlgmr.msra.gmra.mrb[10].mxu0 %v5600_v55 }
 0xf28   :  { %8347 = vmatpush3.msra.mxu0 %v5525_v42  ;;  %8348 = vmatprep.mubr.f32.mxu0 %v5590_v59  ;;  %v6543_v42 = vld [vmem:[%s9395_s13 + $0x8] sm:$0xff] }
 0xf29   :  { %8562 = vmatprep.subr.bf16.mxu0 %v8561_v54  ;;  %v6561_v44 = vand.u32 4294901760, %v6543_v42 }
 0xf2b   :  { %v6653_v46 = vsub.f32 %v6543_v42, %v6561_v44 }
 0xf2d   :  { %v6654_v48 = vand.u32 4294901760, %v6653_v46 }
 0xf2f   :  { %8349 = vmatmul.mubr.f32.vlgmr.msra.gmra.mrb[10].mxu0 %v5600_v55  ;;  %v6655_v49 = vsub.f32 %v6653_v46, %v6654_v48 }
 0xf30   :  { %8564 = vmatpush3.bf16.msra.mxu0 %v8561_v54 }
 0xf31   :  { %8566 = vmatprep.subr.bf16.mxu0 %v8565_v22  ;;  %v6656_v52 = vand.u32 4294901760, %v6655_v49 }
0x1002   :  { %v8350_v25 = vpop.f32.mrb[10].mxu0 }
0x1003   :  { %v8629_v26 = vadd.f32 %v8350_v25, %v7609_v24  ;;  %v6003_v27 = vpop.f32.mrb[11].mxu0 }
0x1004   :  { %v8630_v57 = vadd.f32 %v7609_v24, %v6003_v27  ;;  %v7611_v24 = vld [vmem:[%s9399_s14] ss:$0 sm:$0xff] }
0x1005   :  { %v6020_v29 = vadd.f32 %v8629_v26, %v6018_v28 }
0x1006   :  { %v6019_v31 = vadd.f32 %v8630_v57, %v9278_v51  ;;  %v6542_v51 = vld [vmem:[%s9395_s13] sm:$0xff] }
0x1007   :  { %v6022_v5 = vmax.f32 %v6020_v29, 0.0  ;;  %v6558_v43 = vand.u32 4294901760, %v6542_v51 }
0x1008   :  { %v6021_v32 = vmax.f32 %v6019_v31, 0.0 }
0x1009   :  { %v6036_v33 = vsel %vm1629_vm11, %v6022_v5, 0  ;;  %v8585_v45 = vpack.c.bf16 %v6561_v44, %v6558_v43  ;;  %v6646_v2 = vsub.f32 %v6542_v51, %v6558_v43 }
0x100a   :  { %v6115_v34 = vand.u32 4294901760, %v6036_v33  ;;  %v6033_v30 = vsel %vm1629_vm11, %v6021_v32, 0 }
0x100b   :  { %v6105_v35 = vand.u32 4294901760, %v6033_v30  ;;  %8586 = vmatprep.subr.bf16.mxu1 %v8585_v45  ;;  %v6647_v47 = vand.u32 4294901760, %v6646_v2  ;;  %v8593_v8 = vpack.c.bf16 %v6653_v46, %v6646_v2 }
0x100c   :  { %v6116_v36 = vsub.f32 %v6036_v33, %v6115_v34  ;;  %8588 = vmatpush3.bf16.msra.mxu1 %v8585_v45 }
0x100d   :  { %v6106_v37 = vsub.f32 %v6033_v30, %v6105_v35  ;;  %v6648_v0 = vsub.f32 %v6646_v2, %v6647_v47  ;;  %v8601_v55 = vpack.c.bf16 %v6654_v48, %v6647_v47 }
0x100e   :  { %v6117_v38 = vand.u32 4294901760, %v6116_v36 }
0x100f   :  { %v6107_v40 = vand.u32 4294901760, %v6106_v37  ;;  %v6649_v50 = vand.u32 4294901760, %v6648_v0 }
0x1010   :  { %v6118_v7 = vsub.f32 %v6116_v36, %v6117_v38 }
0x1011   :  { %v6108_v41 = vsub.f32 %v6106_v37, %v6107_v40  ;;  %v8589_v53 = vpack.c.bf16 %v6656_v52, %v6649_v50 }
0x1012   :  { %v6119_v39 = vand.u32 4294901760, %v6118_v7 }
0x1013   :  { %v6109_v60 = vand.u32 4294901760, %v6108_v41  ;;  %8590 = vmatprep.subr.bf16.mxu1 %v8589_v53 }
0x1015   :  { %8355 = vmatprep.mubr.f32.mxu0 %v6109_v60 }
0x1016   :  { %8356 = vmatmul.mubr.f32.vlgmr.msra.gmra.mrb[12].mxu0 %v6119_v39 }
0x1017   :  { %8568 = vmatpush3.bf16.msra.mxu0 %v8565_v22  ;;  %8362 = vmatprep.mubr.f32.mxu0 %v6105_v35 }
0x1018   :  { %8570 = vmatprep.subr.bf16.mxu0 %v8569_v21 }
0x101e   :  { %8363 = vmatmul.mubr.f32.vlgmr.msra.gmra.mrb[12].mxu0 %v6115_v34 }
0x101f   :  { %8572 = vmatpush3.bf16.msra.mxu0 %v8569_v21  ;;  %8369 = vmatprep.mubr.f32.mxu0 %v6106_v37  ;;  %v7165_v21 = vsub.f32 %v7163_v20, %v7164_v15 }
0x1020   :  { %8574 = vmatprep.subr.bf16.mxu0 %v8561_v54 }
0x1021   :  { %v7166_v22 = vand.u32 4294901760, %v7165_v21 }
0x1026   :  { %8370 = vmatmul.mubr.f32.vlgmr.msra.gmra.mrb[12].mxu0 %v6116_v36 }
0x1027   :  { %8576 = vmatpush3.bf16.msra.mxu0 %v8561_v54  ;;  %8376 = vmatprep.mubr.f32.mxu0 %v6107_v40 }
0x1028   :  { %8578 = vmatprep.subr.bf16.mxu0 %v8577_v23 }
0x102e   :  { %8377 = vmatmul.mubr.f32.vlgmr.msra.gmra.mrb[12].mxu0 %v6117_v38 }
0x102f   :  { %8580 = vmatpush3.bf16.msra.mxu0 %v8577_v23  ;;  %8383 = vmatprep.mubr.f32.mxu0 %v6105_v35  ;;  %v22_v23 = vstv %s9398_s16 }
0x1030   :  { %8582 = vmatprep.subr.bf16.mxu0 %v8561_v54  ;;  %23 = vst [vmem:[#allocation2] sm:$0x1] %v22_v23 }
0x1036   :  { %8384 = vmatmul.mubr.f32.vlgmr.msra.gmra.mrb[12].mxu0 %v6115_v34 }
0x1037   :  { %8584 = vmatpush3.bf16.msra.mxu0 %v8561_v54  ;;  %8390 = vmatprep.mubr.f32.mxu0 %v6105_v35  ;;  %v7612_v41 = vld [vmem:[#allocation2] ss:$0 sm:$0xff] }
0x1038   :  { %8435 = vmatprep.subr.mxu0 %v7076_v19 }
0x103e   :  { %8391 = vmatmul.mubr.f32.vlgmr.msra.gmra.mrb[12].mxu0 %v6115_v34 }
0x103f   :  { %8436 = vmatpush3.msra.mxu0 %v7076_v19 }
0x1040   :  { %8440 = vmatprep.subr.mxu0 %v7166_v22 }
0x1111   :  { %v8392_v59 = vpop.f32.mrb[12].mxu0 }
0x1112   :  { %v8631_v62 = vadd.f32 %v8392_v59, %v7610_v56  ;;  %v6530_v63 = vpop.f32.mrb[13].mxu0 }
0x1113   :  { %v8632_v1 = vadd.f32 %v7610_v56, %v6530_v63 }
0x1114   :  { %v6541_v3 = vmax.f32 %v8631_v62, 0.0 }
0x1115   :  { %v6540_v4 = vmax.f32 %v8632_v1, 0.0 }
0x1116   :  { %v6555_v6 = vsel %vm1629_vm11, %v6541_v3, 0 }
0x1117   :  { %v6634_v61 = vand.u32 4294901760, %v6555_v6  ;;  %v6552_v9 = vsel %vm1629_vm11, %v6540_v4, 0 }
0x1118   :  { %v6624_v10 = vand.u32 4294901760, %v6552_v9 }
0x1119   :  { %v6635_v11 = vsub.f32 %v6555_v6, %v6634_v61 }
0x111a   :  { %v6625_v12 = vsub.f32 %v6552_v9, %v6624_v10 }
0x111b   :  { %v6636_v13 = vand.u32 4294901760, %v6635_v11 }
0x111c   :  { %v6626_v54 = vand.u32 4294901760, %v6625_v12 }
0x111d   :  { %v6637_v14 = vsub.f32 %v6635_v11, %v6636_v13 }
0x111e   :  { %v6627_v16 = vsub.f32 %v6625_v12, %v6626_v54 }
0x111f   :  { %v6638_v58 = vand.u32 4294901760, %v6637_v14 }
0x1120   :  { %v6628_v17 = vand.u32 4294901760, %v6627_v16 }
0x1122   :  { %8397 = vmatprep.mubr.f32.mxu1 %v6628_v17 }
0x1123   :  { %8398 = vmatmul.mubr.f32.vlgmr.msra.gmra.mrb[12].mxu1 %v6638_v58 }
0x1124   :  { %8592 = vmatpush3.bf16.msra.mxu1 %v8589_v53  ;;  %8404 = vmatprep.mubr.f32.mxu1 %v6624_v10 }
0x1125   :  { %8594 = vmatprep.subr.bf16.mxu1 %v8593_v8 }
0x112b   :  { %8405 = vmatmul.mubr.f32.vlgmr.msra.gmra.mrb[12].mxu1 %v6634_v61 }
0x112c   :  { %8596 = vmatpush3.bf16.msra.mxu1 %v8593_v8  ;;  %8411 = vmatprep.mubr.f32.mxu1 %v6625_v12 }
0x112d   :  { %8598 = vmatprep.subr.bf16.mxu1 %v8585_v45 }
0x1133   :  { %8412 = vmatmul.mubr.f32.vlgmr.msra.gmra.mrb[12].mxu1 %v6635_v11 }
0x1134   :  { %8600 = vmatpush3.bf16.msra.mxu1 %v8585_v45  ;;  %8418 = vmatprep.mubr.f32.mxu1 %v6626_v54 }
0x1135   :  { %8602 = vmatprep.subr.bf16.mxu1 %v8601_v55 }
0x113b   :  { %8419 = vmatmul.mubr.f32.vlgmr.msra.gmra.mrb[12].mxu1 %v6636_v13 }
0x113c   :  { %8604 = vmatpush3.bf16.msra.mxu1 %v8601_v55  ;;  %8425 = vmatprep.mubr.f32.mxu1 %v6624_v10 }
0x113d   :  { %8606 = vmatprep.subr.bf16.mxu1 %v8585_v45 }
0x1143   :  { %8426 = vmatmul.mubr.f32.vlgmr.msra.gmra.mrb[12].mxu1 %v6634_v61 }
0x1144   :  { %8608 = vmatpush3.bf16.msra.mxu1 %v8585_v45  ;;  %8432 = vmatprep.mubr.f32.mxu1 %v6624_v10 }
0x114b   :  { %8433 = vmatmul.mubr.f32.vlgmr.msra.gmra.mrb[12].mxu1 %v6634_v61 }
0x121e   :  { %v8434_v25 = vpop.f32.mrb[12].mxu1 }
0x121f   :  { %v8633_v26 = vadd.f32 %v8434_v25, %v7611_v24  ;;  %v7049_v27 = vpop.f32.mrb[13].mxu1 }
0x1220   :  { %v8634_v28 = vadd.f32 %v7611_v24, %v7049_v27 }
0x1221   :  { %v7060_v57 = vmax.f32 %v8633_v26, 0.0 }
0x1222   :  { %v7059_v29 = vmax.f32 %v8634_v28, 0.0 }
0x1223   :  { %v7073_v31 = vsel %vm1091_vm6, %v7060_v57, 0 }
0x1224   :  { %v7151_v5 = vand.u32 4294901760, %v7073_v31  ;;  %v7070_v32 = vsel %vm1091_vm6, %v7059_v29, 0 }
0x1225   :  { %v7141_v33 = vand.u32 4294901760, %v7070_v32 }
0x1226   :  { %v7152_v34 = vsub.f32 %v7073_v31, %v7151_v5 }
0x1227   :  { %v7142_v30 = vsub.f32 %v7070_v32, %v7141_v33 }
0x1228   :  { %v7153_v35 = vand.u32 4294901760, %v7152_v34 }
0x1229   :  { %v7143_v36 = vand.u32 4294901760, %v7142_v30 }
0x122a   :  { %v7154_v37 = vsub.f32 %v7152_v34, %v7153_v35 }
0x122b   :  { %v7144_v38 = vsub.f32 %v7142_v30, %v7143_v36 }
0x122c   :  { %v7155_v7 = vand.u32 4294901760, %v7154_v37 }
0x122d   :  { %v7145_v40 = vand.u32 4294901760, %v7144_v38 }
0x122f   :  { %8437 = vmatprep.mubr.f32.mxu0 %v7145_v40 }
0x1230   :  { %8438 = vmatmul.mubr.f32.vlgmr.msra.gmra.mrb[14].mxu0 %v7155_v7 }
0x1231   :  { %8441 = vmatpush3.msra.mxu0 %v7166_v22  ;;  %8442 = vmatprep.mubr.f32.mxu0 %v7141_v33 }
0x1232   :  { %8445 = vmatprep.subr.mxu0 %v7163_v20 }
0x1238   :  { %8443 = vmatmul.mubr.f32.vlgmr.msra.gmra.mrb[14].mxu0 %v7151_v5 }
0x1239   :  { %8446 = vmatpush3.msra.mxu0 %v7163_v20  ;;  %8447 = vmatprep.mubr.f32.mxu0 %v7142_v30 }
0x123a   :  { %8450 = vmatprep.subr.mxu0 %v7076_v19 }
0x1240   :  { %8448 = vmatmul.mubr.f32.vlgmr.msra.gmra.mrb[14].mxu0 %v7152_v34 }
0x1241   :  { %8451 = vmatpush3.msra.mxu0 %v7076_v19  ;;  %8452 = vmatprep.mubr.f32.mxu0 %v7143_v36 }
0x1242   :  { %8455 = vmatprep.subr.mxu0 %v7164_v15 }
0x1248   :  { %8453 = vmatmul.mubr.f32.vlgmr.msra.gmra.mrb[14].mxu0 %v7153_v35 }
0x1249   :  { %8456 = vmatpush3.msra.mxu0 %v7164_v15  ;;  %8457 = vmatprep.mubr.f32.mxu0 %v7141_v33 }
0x124a   :  { %8460 = vmatprep.subr.mxu0 %v7076_v19 }
0x1250   :  { %8458 = vmatmul.mubr.f32.vlgmr.msra.gmra.mrb[14].mxu0 %v7151_v5 }
0x1251   :  { %8461 = vmatpush3.msra.mxu0 %v7076_v19  ;;  %8462 = vmatprep.mubr.f32.mxu0 %v7141_v33 }
0x1258   :  { %8463 = vmatmul.mubr.f32.vlgmr.msra.gmra.mrb[14].mxu0 %v7151_v5 }
0x132b   :  { %v8464_v60 = vpop.f32.mrb[14].mxu0 }
0x132c   :  { %v8635_v39 = vadd.f32 %v8464_v60, %v7612_v41  ;;  %v7554_v51 = vpop.f32.mrb[15].mxu0 }
0x132d   :  { %v8636_v42 = vadd.f32 %v7612_v41, %v7554_v51 }
0x132e   :  { %7565 = vst.msk [vmem:[%s9400_s17 + $0x8] sm:$0xff] %vm68_vm3, %v8635_v39 }
0x132f   :  { %7564 = vst.msk [vmem:[%s9400_s17] sm:$0xff] %vm68_vm3, %v8636_v42 }

</bundles_post_ra>
